<compile_context>
chip_gen: v5e
topology: v5e:2x2
jax: 0.10.0
libtpu: 0.0.40
codegen_flags: <defaults>
</compile_context>

<pallas_src>
import functools

import jax
import jax.numpy as jnp
from jax import lax
from jax.experimental import pallas as pl
from jax.experimental.pallas import tpu as pltpu

MIN_VAL = 1e-6


def _round_up(x, m):
    return ((x + m - 1) // m) * m


def _l2_normalize(x, eps):
    # torch.nn.functional.normalize(x, dim=-1, eps) == x / max(||x||, eps)
    x = x.astype(jnp.float32)
    n2 = jnp.sum(x * x, axis=-1, keepdims=True)
    return x * lax.rsqrt(jnp.maximum(n2, jnp.float32(eps * eps)))


def _word_loss_kernel(txt_len_ref, img_len_ref, txt_ref, img_ref, img_valid_ref,
                      rs_ref, alphas_ref, *, gamma1, gamma2,
                      normalize_across_spans):
    """One grid step: a = text/caption batch index.

    txt_len_ref:   (bs,)  int32 in SMEM (scalar prefetch)
    img_len_ref:   (bs,)  int32 in SMEM (scalar prefetch)
    txt_ref:       (1, Lsp, D)  VMEM tile of normalized txt[a]         (padded)
    img_ref:       (bs, L, D)   full normalized image batch, resident  (padded)
    img_valid_ref: (bs, L)      1.0 where region index < img_len[b]
    rs_ref:        (1, 1, bs)   -> sample_rs[a, :]   (lane-dense)
    alphas_ref:    (1, Lsp, L)  -> attention map of the diagonal pair (a, a)
    """
    a = pl.program_id(0)
    bs, lp, dp = img_ref.shape
    tlp = txt_ref.shape[1]

    eps = jnp.float32(MIN_VAL)
    neg_inf = jnp.float32(-jnp.inf)
    inv_g2 = jnp.float32(1.0 / gamma2)

    txt_n = txt_ref[0]                 # (Lsp, D)  already L2-normalized
    img_n = img_ref[...]               # (bs, L, D) already L2-normalized
    txt_len_a = txt_len_ref[a]

    # ---- batched attention of txt[a] against the whole image batch -------------
    # Leading-dim broadcast is a replicated Mosaic layout (kept because a 2D x 3D
    # dot_general is not a supported Mosaic lowering; this is the known-good
    # 'btd,bid->bti' batched-MXU form).
    txt_b = jnp.broadcast_to(txt_n[None], (bs, tlp, dp))
    s = jnp.einsum('btd,bid->bti', txt_b, img_n,
                   preferred_element_type=jnp.float32)           # (bs, Lsp, L)

    t_invalid = lax.broadcasted_iota(jnp.int32, (1, tlp, 1), 1) >= txt_len_a
    i_invalid = (img_valid_ref[...] < 0.5)[:, None, :]           # (bs, 1, L)
    mask = jnp.logical_or(t_invalid, i_invalid)                  # (bs, Lsp, L)

    s = jnp.where(mask, neg_inf, s)
    if normalize_across_spans:
        e = jnp.exp(s)
        s = e / (jnp.sum(e, axis=1, keepdims=True) + eps)        # sum over spans
        s = jnp.where(mask, neg_inf, s)

    # attention over image regions; masked entries -> exp(-inf) = 0
    al = jnp.exp(s * gamma1)
    al = al / (jnp.sum(al, axis=-1, keepdims=True) + eps)

    # region contexts per text span and per-span relevance
    ctx = jnp.einsum('bti,bid->btd', al, img_n,
                     preferred_element_type=jnp.float32)         # (bs, Lsp, D)
    ctx_n = ctx * lax.rsqrt(
        jnp.maximum(jnp.sum(ctx * ctx, axis=-1, keepdims=True), eps * eps))

    r = jnp.sum(txt_n[None].astype(jnp.float32) * ctx_n, axis=-1)   # (bs, Lsp)
    r = jnp.where(lax.broadcasted_iota(jnp.int32, (1, tlp), 1) >= txt_len_a,
                  neg_inf, r)
    er = jnp.exp(r * gamma2)                                     # masked -> 0
    # log(pow(sum, 1/g2)) == log(sum) / g2   (AttnGAN eq. 10, R(Q, D))
    rs_vals = jnp.log(jnp.sum(er, axis=-1)) * inv_g2             # (bs,)
    rs_ref[0] = rs_vals[None, :].astype(rs_ref.dtype)            # lane-dense (1, bs)

    # ---- diagonal pair (a, a) attention map, recomputed from resident img ------
    img_a = img_ref[a]                                           # (L, D) dyn. index
    s_d = jnp.einsum('td,id->ti', txt_n, img_a,
                     preferred_element_type=jnp.float32)         # (Lsp, L)
    t_inv_d = lax.broadcasted_iota(jnp.int32, (tlp, 1), 0) >= txt_len_a
    i_inv_d = lax.broadcasted_iota(jnp.int32, (1, lp), 1) >= img_len_ref[a]
    mask_d = jnp.logical_or(t_inv_d, i_inv_d)
    s_d = jnp.where(mask_d, neg_inf, s_d)
    if normalize_across_spans:
        e_d = jnp.exp(s_d)
        s_d = e_d / (jnp.sum(e_d, axis=0, keepdims=True) + eps)
        s_d = jnp.where(mask_d, neg_inf, s_d)
    al_d = jnp.exp(s_d * gamma1)
    al_d = al_d / (jnp.sum(al_d, axis=-1, keepdims=True) + eps)
    alphas_ref[0] = al_d.astype(alphas_ref.dtype)


def damsm_word_loss_pallas(txt, img, txt_len, img_len, *, gamma1, gamma2,
                           gamma3, normalize_across_spans, storage_dtype=None):
    """JAX/Pallas equivalent of DAMSMWordLoss.forward.

    Returns (result[bs], alphas_diag_T[bs, L, Lsp]) matching the PyTorch module.
    """
    bs, tl_, d = txt.shape
    bs_i, il_, d_i = img.shape
    assert bs_i == bs and d_i == d

    if storage_dtype is None:
        # Preserve caller numerics: bf16 stays bf16 (halves HBM/VMEM), f32 stays f32.
        storage_dtype = (jnp.bfloat16
                         if (txt.dtype == jnp.bfloat16 and img.dtype == jnp.bfloat16)
                         else jnp.float32)

    dp = _round_up(d, 128)     # lane-dense feature dim
    tlp = _round_up(tl_, 8)    # sublane-aligned spans
    lp = _round_up(il_, 128)   # regions = lane axis of s/al/alphas -> keep lane-dense

    # Hoisted L2 normalization (once here, instead of once per grid step), fused
    # with the zero-padding pass.
    txt_n = _l2_normalize(txt, MIN_VAL).astype(storage_dtype)
    img_n = _l2_normalize(img, MIN_VAL).astype(storage_dtype)
    txt_p = jnp.zeros((bs, tlp, dp), storage_dtype).at[:, :tl_, :d].set(txt_n)
    img_p = jnp.zeros((bs, lp, dp), storage_dtype).at[:, :il_, :d].set(img_n)
    img_valid = (jnp.arange(lp, dtype=jnp.int32)[None, :]
                 < img_len.astype(jnp.int32)[:, None]).astype(jnp.float32)
    txt_len_i = txt_len.astype(jnp.int32)
    img_len_i = img_len.astype(jnp.int32)

    kernel = functools.partial(
        _word_loss_kernel, gamma1=float(gamma1), gamma2=float(gamma2),
        normalize_across_spans=bool(normalize_across_spans))

    itemsize = jnp.dtype(storage_dtype).itemsize
    flops = 4 * bs * bs * tlp * lp * dp + 2 * bs * tlp * lp * dp
    transcend = 3 * bs * bs * tlp * lp
    bytes_acc = ((bs * tlp * dp + bs * lp * dp) * itemsize
                 + bs * lp * 4 + bs * bs * 4 + bs * tlp * lp * 4)
    cost = pl.CostEstimate(flops=int(flops), transcendentals=int(transcend),
                           bytes_accessed=int(bytes_acc))

    def build(single_buffer_resident):
        # Resident blocks (constant index_map): single-buffer them when supported.
        resident_kw = ({'pipeline_mode': pl.Buffered(1)}
                       if single_buffer_resident else {})
        img_bufs = 1 if single_buffer_resident else 2
        # VMEM budget from actual block sizes (+25% headroom), clamped to 32..64 MiB.
        vmem_need = (img_bufs * (bs * lp * dp * itemsize + bs * lp * 4)
                     + 2 * tlp * dp * itemsize
                     + 2 * (tlp * lp * 4 + bs * 4)
                     + 3 * bs * tlp * lp * 4
                     + 2 * bs * tlp * dp * 4)
        vmem_limit = int(min(max(vmem_need * 5 // 4 + (4 << 20), 32 << 20), 64 << 20))
        return pl.pallas_call(
            kernel,
            out_shape=(jax.ShapeDtypeStruct((bs, 1, bs), jnp.float32),
                       jax.ShapeDtypeStruct((bs, tlp, lp), jnp.float32)),
            grid_spec=pltpu.PrefetchScalarGridSpec(
                num_scalar_prefetch=2,                              # txt_len, img_len -> SMEM
                grid=(bs,),
                in_specs=[
                    pl.BlockSpec((1, tlp, dp), lambda a, *_: (a, 0, 0)),
                    pl.BlockSpec((bs, lp, dp), lambda a, *_: (0, 0, 0), **resident_kw),
                    pl.BlockSpec((bs, lp), lambda a, *_: (0, 0), **resident_kw),
                ],
                out_specs=[
                    pl.BlockSpec((1, 1, bs), lambda a, *_: (a, 0, 0)),
                    pl.BlockSpec((1, tlp, lp), lambda a, *_: (a, 0, 0)),
                ]),
            compiler_params=pltpu.CompilerParams(
                dimension_semantics=("parallel",),                  # megacore over `a`
                vmem_limit_bytes=vmem_limit),
            cost_estimate=cost,
        )

    args = (txt_len_i, img_len_i, txt_p, img_p, img_valid)
    try:
        rs3, alphas_p = build(True)(*args)
    except Exception:
        # Fallback: default (double-buffered) resident blocks if pl.Buffered(1)
        # is not accepted by this JAX version.
        rs3, alphas_p = build(False)(*args)

    sample_rs = rs3[:, 0, :]                                     # (bs_txt, bs_img)
    prob_num = jnp.exp(sample_rs * gamma3)
    loss_txt = prob_num / (jnp.sum(prob_num, axis=0) + MIN_VAL)
    loss_img = prob_num / (jnp.sum(prob_num, axis=-1, keepdims=True) + MIN_VAL)
    result = -jnp.log(jnp.diagonal(loss_txt)) - jnp.log(jnp.diagonal(loss_img))
    # torch: zeros(bs) if any element is non-finite
    result = jnp.where(jnp.all(jnp.isfinite(result)), result,
                       jnp.zeros_like(result))
    # torch: alphas2.diagonal(dim1=0, dim2=1).T  -> (bs, L, Lsp)
    alphas_ret = jnp.swapaxes(alphas_p[:, :tl_, :il_], 1, 2)
    return result, alphas_ret


def multi_object_contrastive_attn_loss(img_embs, txt_embs, img_lens, txt_lens, *,
                                       gamma1, gamma2, gamma3,
                                       normalize_across_spans, switch):
    """JAX/Pallas equivalent of MultiObjectContrastiveAttnLoss.forward."""
    if img_embs.shape[-1] != txt_embs.shape[-1]:
        raise ValueError
    if switch:
        img_embs, txt_embs, img_lens, txt_lens = (
            txt_embs, img_embs, txt_lens, img_lens)
    word_loss, alphas2 = damsm_word_loss_pallas(
        txt_embs, img_embs, txt_lens, img_lens,
        gamma1=gamma1, gamma2=gamma2, gamma3=gamma3,
        normalize_across_spans=normalize_across_spans)
    return jnp.mean(word_loss), alphas2


# -------------------------- pure-JAX reference (for self-check) --------------------------
def _reference_word_loss(txt, img, txt_len, img_len, *, gamma1, gamma2, gamma3,
                         normalize_across_spans):
    bs, tl, _ = txt.shape
    _, il, _ = img.shape
    txt_n = _l2_normalize(txt, MIN_VAL)
    img_n = _l2_normalize(img, MIN_VAL)
    txt_mask = jnp.arange(tl)[None, :] >= txt_len[:, None]
    img_mask = jnp.arange(il)[None, :] >= img_len[:, None]
    mask = txt_mask[:, None, :, None] | img_mask[None, :, None, :]
    s = jnp.einsum('atd,bid->abti', txt_n, img_n)
    s = jnp.where(mask, -jnp.inf, s)
    if normalize_across_spans:
        e = jnp.exp(s)
        s = e / (jnp.sum(e, axis=-2, keepdims=True) + MIN_VAL)
        s = jnp.where(mask, -jnp.inf, s)
    al = jnp.exp(s * gamma1)
    al = al / (jnp.sum(al, axis=-1, keepdims=True) + MIN_VAL)
    ctx = jnp.einsum('abti,bid->abtd', al, img_n)
    ctx_n = _l2_normalize(ctx, MIN_VAL)
    r = jnp.einsum('atd,abtd->abt', txt_n, ctx_n)
    r = jnp.where(txt_mask[:, None, :], -jnp.inf, r)
    sample_rs = jnp.log(jnp.sum(jnp.exp(r * gamma2), axis=-1)) / gamma2
    prob_num = jnp.exp(sample_rs * gamma3)
    loss_txt = prob_num / (jnp.sum(prob_num, axis=0) + MIN_VAL)
    loss_img = prob_num / (jnp.sum(prob_num, axis=-1, keepdims=True) + MIN_VAL)
    result = -jnp.log(jnp.diagonal(loss_txt)) - jnp.log(jnp.diagonal(loss_img))
    result = jnp.where(jnp.all(jnp.isfinite(result)), result, jnp.zeros_like(result))
    alphas_diag = al[jnp.arange(bs), jnp.arange(bs)]      # (bs, tl, il)
    return result, jnp.swapaxes(alphas_diag, 1, 2)        # (bs, il, tl)


if __name__ == "__main__":
    # Synthetic "opt" (AttnGAN defaults); margin / sent_loss are unused in forward.
    GAMMA1, GAMMA2, GAMMA3 = 4.0, 5.0, 10.0
    NORMALIZE_ACROSS_SPANS = False
    SWITCH = False

    bs, lsp, l, d = 2, 8, 16, 32
    key = jax.random.PRNGKey(0)
    k_img, k_txt = jax.random.split(key)
    img_embs = jax.random.normal(k_img, (bs, l, d), dtype=jnp.float32)
    txt_embs = jax.random.normal(k_txt, (bs, lsp, d), dtype=jnp.float32)
    img_lens = jnp.array([16, 12], dtype=jnp.int32)
    txt_lens = jnp.array([6, 8], dtype=jnp.int32)

    loss, alphas = multi_object_contrastive_attn_loss(
        img_embs, txt_embs, img_lens, txt_lens,
        gamma1=GAMMA1, gamma2=GAMMA2, gamma3=GAMMA3,
        normalize_across_spans=NORMALIZE_ACROSS_SPANS, switch=SWITCH)

    loss = jax.block_until_ready(loss)
    alphas = jax.block_until_ready(alphas)
    assert alphas.shape == (bs, l, lsp)
    assert loss.shape == ()
    assert bool(jnp.isfinite(loss))

    # Self-check against a pure-JAX reference of the PyTorch module.
    ref_result, ref_alphas = _reference_word_loss(
        txt_embs, img_embs, txt_lens, img_lens,
        gamma1=GAMMA1, gamma2=GAMMA2, gamma3=GAMMA3,
        normalize_across_spans=NORMALIZE_ACROSS_SPANS)
    ref_loss = jnp.mean(ref_result)
    assert bool(jnp.allclose(loss, ref_loss, rtol=5e-2, atol=5e-2))
    assert bool(jnp.allclose(alphas, ref_alphas, rtol=5e-2, atol=5e-2))

    print("KERNEL_OK")
</pallas_src>

<mosaic_0001>
module attributes {stable_mosaic.version = 11 : i64} {
  func.func @_word_loss_kernel(%arg0: i32, %arg1: memref<2xi32, #tpu.memory_space<smem>>, %arg2: memref<2xi32, #tpu.memory_space<smem>>, %arg3: memref<1x8x128xf32, #tpu.memory_space<vmem>>, %arg4: memref<2x128x128xf32, #tpu.memory_space<vmem>>, %arg5: memref<2x128xf32, #tpu.memory_space<vmem>>, %arg6: memref<1x1x2xf32, #tpu.memory_space<vmem>>, %arg7: memref<1x8x128xf32, #tpu.memory_space<vmem>>) attributes {dimension_semantics = [#tpu.dimension_semantics<parallel>], iteration_bounds = array<i64: 2>, scalar_prefetch = 2 : i64, scratch_operands = 0 : i64, tpu.core_type = #tpu.core_type<tc>, window_params = [{transform_indices = @transform_0, window_bounds = array<i64: 1, 8, 128>}, {pipeline_mode = #tpu.pipeline_mode<synchronous>, transform_indices = @transform_1, window_bounds = array<i64: 2, 128, 128>}, {pipeline_mode = #tpu.pipeline_mode<synchronous>, transform_indices = @transform_2, window_bounds = array<i64: 2, 128>}, {transform_indices = @transform_3, window_bounds = array<i64: 1, 1, 2>}, {transform_indices = @transform_4, window_bounds = array<i64: 1, 8, 128>}]} {
    %c0 = arith.constant 0 : index
    %c0_0 = arith.constant 0 : index
    %c0_1 = arith.constant 0 : index
    %0 = vector.load %arg3[%c0, %c0_0, %c0_1] : memref<1x8x128xf32, #tpu.memory_space<vmem>>, vector<1x8x128xf32>
    %1 = vector.shape_cast %0 : vector<1x8x128xf32> to vector<8x128xf32>
    %c0_2 = arith.constant 0 : index
    %c0_3 = arith.constant 0 : index
    %c0_4 = arith.constant 0 : index
    %2 = vector.load %arg4[%c0_2, %c0_3, %c0_4] : memref<2x128x128xf32, #tpu.memory_space<vmem>>, vector<2x128x128xf32>
    %3 = arith.index_cast %arg0 : i32 to index
    %4 = memref.load %arg1[%3] : memref<2xi32, #tpu.memory_space<smem>>
    %5 = vector.shape_cast %1 : vector<8x128xf32> to vector<1x8x128xf32>
    %6 = vector.shape_cast %5 : vector<1x8x128xf32> to vector<1x8x128xf32>
    %7 = vector.broadcast %6 : vector<1x8x128xf32> to vector<2x8x128xf32>
    "tpu.trace_start"() <{level = 10 : i32, message = "btd,bid->bti"}> : () -> ()
    %cst = arith.constant dense<0.000000e+00> : vector<2x8x128xf32>
    %8 = tpu.matmul %7, %2, %cst {dimension_numbers = #tpu.dot_dimension_numbers<[2], [2], [1], [1], [0, 0, 0, 1, 1, 1], [0], [0]>} : vector<2x8x128xf32>, vector<2x128x128xf32>, vector<2x8x128xf32> -> vector<2x8x128xf32>
    "tpu.trace_stop"() : () -> ()
    %9 = tpu.iota {dimensions = array<i32: 1>} : vector<1x8x1xi32>
    %10 = vector.broadcast %4 : i32 to vector<1x8x1xi32>
    %11 = arith.cmpi sge, %9, %10 : vector<1x8x1xi32>
    %c0_5 = arith.constant 0 : index
    %c0_6 = arith.constant 0 : index
    %12 = vector.load %arg5[%c0_5, %c0_6] : memref<2x128xf32, #tpu.memory_space<vmem>>, vector<2x128xf32>
    %cst_7 = arith.constant 5.000000e-01 : f32
    %13 = vector.broadcast %cst_7 : f32 to vector<2x128xf32>
    %14 = arith.cmpf olt, %12, %13 : vector<2x128xf32>
    %15 = vector.shape_cast %14 : vector<2x128xi1> to vector<2x1x128xi1>
    %16 = vector.broadcast %11 : vector<1x8x1xi1> to vector<2x8x128xi1>
    %17 = vector.broadcast %15 : vector<2x1x128xi1> to vector<2x8x128xi1>
    %18 = arith.ori %16, %17 : vector<2x8x128xi1>
    %cst_8 = arith.constant 0xFF800000 : f32
    %19 = vector.broadcast %cst_8 : f32 to vector<2x8x128xf32>
    %20 = arith.select %18, %19, %8 : vector<2x8x128xi1>, vector<2x8x128xf32>
    %cst_9 = arith.constant 4.000000e+00 : f32
    %21 = vector.broadcast %cst_9 : f32 to vector<2x8x128xf32>
    %22 = arith.mulf %20, %21 : vector<2x8x128xf32>
    %23 = math.exp %22 : vector<2x8x128xf32>
    %cst_10 = arith.constant dense<0.000000e+00> : vector<2x8xf32>
    %24 = vector.multi_reduction <add>, %23, %cst_10 [2] : vector<2x8x128xf32> to vector<2x8xf32>
    %25 = vector.shape_cast %24 : vector<2x8xf32> to vector<2x8x1xf32>
    %cst_11 = arith.constant 9.99999997E-7 : f32
    %26 = vector.broadcast %cst_11 : f32 to vector<2x8x1xf32>
    %27 = arith.addf %25, %26 : vector<2x8x1xf32>
    %28 = vector.broadcast %27 : vector<2x8x1xf32> to vector<2x8x128xf32>
    %29 = arith.divf %23, %28 : vector<2x8x128xf32>
    "tpu.trace_start"() <{level = 10 : i32, message = "bti,bid->btd"}> : () -> ()
    %cst_12 = arith.constant dense<0.000000e+00> : vector<2x8x128xf32>
    %30 = tpu.matmul %29, %2, %cst_12 {dimension_numbers = #tpu.dot_dimension_numbers<[2], [1], [1], [2], [0, 0, 0, 1, 1, 2], [0], [0]>} : vector<2x8x128xf32>, vector<2x128x128xf32>, vector<2x8x128xf32> -> vector<2x8x128xf32>
    "tpu.trace_stop"() : () -> ()
    %31 = arith.mulf %30, %30 : vector<2x8x128xf32>
    %cst_13 = arith.constant dense<0.000000e+00> : vector<2x8xf32>
    %32 = vector.multi_reduction <add>, %31, %cst_13 [2] : vector<2x8x128xf32> to vector<2x8xf32>
    %33 = vector.shape_cast %32 : vector<2x8xf32> to vector<2x8x1xf32>
    %cst_14 = arith.constant 9.99999997E-7 : f32
    %cst_15 = arith.constant 9.99999997E-7 : f32
    %34 = arith.mulf %cst_14, %cst_15 : f32
    %35 = vector.broadcast %34 : f32 to vector<2x8x1xf32>
    %36 = arith.maximumf %33, %35 : vector<2x8x1xf32>
    %37 = math.rsqrt %36 : vector<2x8x1xf32>
    %38 = vector.broadcast %37 : vector<2x8x1xf32> to vector<2x8x128xf32>
    %39 = arith.mulf %30, %38 : vector<2x8x128xf32>
    %40 = vector.shape_cast %1 : vector<8x128xf32> to vector<1x8x128xf32>
    %41 = vector.broadcast %40 : vector<1x8x128xf32> to vector<2x8x128xf32>
    %42 = arith.mulf %41, %39 : vector<2x8x128xf32>
    %cst_16 = arith.constant dense<0.000000e+00> : vector<2x8xf32>
    %43 = vector.multi_reduction <add>, %42, %cst_16 [2] : vector<2x8x128xf32> to vector<2x8xf32>
    %44 = tpu.iota {dimensions = array<i32: 1>} : vector<1x8xi32>
    %45 = vector.broadcast %4 : i32 to vector<1x8xi32>
    %46 = arith.cmpi sge, %44, %45 : vector<1x8xi32>
    %cst_17 = arith.constant 0xFF800000 : f32
    %47 = vector.shape_cast %46 : vector<1x8xi1> to vector<1x8xi1>
    %48 = vector.broadcast %47 : vector<1x8xi1> to vector<2x8xi1>
    %49 = vector.broadcast %cst_17 : f32 to vector<2x8xf32>
    %50 = arith.select %48, %49, %43 : vector<2x8xi1>, vector<2x8xf32>
    %cst_18 = arith.constant 5.000000e+00 : f32
    %51 = vector.broadcast %cst_18 : f32 to vector<2x8xf32>
    %52 = arith.mulf %50, %51 : vector<2x8xf32>
    %53 = math.exp %52 : vector<2x8xf32>
    %cst_19 = arith.constant dense<0.000000e+00> : vector<2xf32>
    %54 = vector.multi_reduction <add>, %53, %cst_19 [1] : vector<2x8xf32> to vector<2xf32>
    %55 = math.log %54 : vector<2xf32>
    %cst_20 = arith.constant 2.000000e-01 : f32
    %56 = vector.broadcast %cst_20 : f32 to vector<2xf32>
    %57 = arith.mulf %55, %56 : vector<2xf32>
    %58 = vector.shape_cast %57 : vector<2xf32> to vector<1x2xf32>
    %c0_21 = arith.constant 0 : index
    %c0_22 = arith.constant 0 : index
    %c0_23 = arith.constant 0 : index
    %59 = vector.load %arg6[%c0_21, %c0_22, %c0_23] : memref<1x1x2xf32, #tpu.memory_space<vmem>>, vector<1x1x2xf32>
    %60 = vector.shape_cast %59 : vector<1x1x2xf32> to vector<1x2xf32>
    %61 = vector.shape_cast %58 : vector<1x2xf32> to vector<1x1x2xf32>
    tpu.vector_store %arg6[%c0_21, %c0_22, %c0_23], %61 {strides = array<i32>} : memref<1x1x2xf32, #tpu.memory_space<vmem>>, vector<1x1x2xf32>,
    %62 = arith.index_cast %arg0 : i32 to index
    %c0_24 = arith.constant 0 : index
    %c0_25 = arith.constant 0 : index
    %63 = vector.load %arg4[%62, %c0_24, %c0_25] : memref<2x128x128xf32, #tpu.memory_space<vmem>>, vector<1x128x128xf32>
    %64 = vector.shape_cast %63 : vector<1x128x128xf32> to vector<128x128xf32>
    "tpu.trace_start"() <{level = 10 : i32, message = "td,id->ti"}> : () -> ()
    %cst_26 = arith.constant dense<0.000000e+00> : vector<8x128xf32>
    %65 = tpu.matmul %1, %64, %cst_26 {dimension_numbers = #tpu.dot_dimension_numbers<[1], [1], [0], [0], [0, 0, 1, 0], [], []>} : vector<8x128xf32>, vector<128x128xf32>, vector<8x128xf32> -> vector<8x128xf32>
    "tpu.trace_stop"() : () -> ()
    %66 = tpu.iota {dimensions = array<i32: 0>} : vector<8x1xi32>
    %67 = vector.broadcast %4 : i32 to vector<8x1xi32>
    %68 = arith.cmpi sge, %66, %67 : vector<8x1xi32>
    %69 = tpu.iota {dimensions = array<i32: 1>} : vector<1x128xi32>
    %70 = arith.index_cast %arg0 : i32 to index
    %71 = memref.load %arg2[%70] : memref<2xi32, #tpu.memory_space<smem>>
    %72 = vector.broadcast %71 : i32 to vector<1x128xi32>
    %73 = arith.cmpi sge, %69, %72 : vector<1x128xi32>
    %74 = vector.broadcast %68 : vector<8x1xi1> to vector<8x128xi1>
    %75 = vector.broadcast %73 : vector<1x128xi1> to vector<8x128xi1>
    %76 = arith.ori %74, %75 : vector<8x128xi1>
    %cst_27 = arith.constant 0xFF800000 : f32
    %77 = vector.broadcast %cst_27 : f32 to vector<8x128xf32>
    %78 = arith.select %76, %77, %65 : vector<8x128xi1>, vector<8x128xf32>
    %cst_28 = arith.constant 4.000000e+00 : f32
    %79 = vector.broadcast %cst_28 : f32 to vector<8x128xf32>
    %80 = arith.mulf %78, %79 : vector<8x128xf32>
    %81 = math.exp %80 : vector<8x128xf32>
    %cst_29 = arith.constant dense<0.000000e+00> : vector<8xf32>
    %82 = vector.multi_reduction <add>, %81, %cst_29 [1] : vector<8x128xf32> to vector<8xf32>
    %83 = vector.shape_cast %82 : vector<8xf32> to vector<8x1xf32>
    %cst_30 = arith.constant 9.99999997E-7 : f32
    %84 = vector.broadcast %cst_30 : f32 to vector<8x1xf32>
    %85 = arith.addf %83, %84 : vector<8x1xf32>
    %86 = vector.broadcast %85 : vector<8x1xf32> to vector<8x128xf32>
    %87 = arith.divf %81, %86 : vector<8x128xf32>
    %c0_31 = arith.constant 0 : index
    %c0_32 = arith.constant 0 : index
    %c0_33 = arith.constant 0 : index
    %88 = vector.load %arg7[%c0_31, %c0_32, %c0_33] : memref<1x8x128xf32, #tpu.memory_space<vmem>>, vector<1x8x128xf32>
    %89 = vector.shape_cast %88 : vector<1x8x128xf32> to vector<8x128xf32>
    %90 = vector.shape_cast %87 : vector<8x128xf32> to vector<1x8x128xf32>
    tpu.vector_store %arg7[%c0_31, %c0_32, %c0_33], %90 {strides = array<i32>} : memref<1x8x128xf32, #tpu.memory_space<vmem>>, vector<1x8x128xf32>,
    return
  }
  func.func @transform_0(%arg0: i32, %arg1: memref<2xi32, #tpu.memory_space<smem>>, %arg2: memref<2xi32, #tpu.memory_space<smem>>) -> (i32, i32, i32) {
    %c0_i32 = arith.constant 0 : i32
    %c0_i32_0 = arith.constant 0 : i32
    %c0_i32_1 = arith.constant 0 : i32
    return %arg0, %c0_i32, %c0_i32_0 : i32, i32, i32
  }
  func.func @transform_1(%arg0: i32, %arg1: memref<2xi32, #tpu.memory_space<smem>>, %arg2: memref<2xi32, #tpu.memory_space<smem>>) -> (i32, i32, i32) {
    %c0_i32 = arith.constant 0 : i32
    %c0_i32_0 = arith.constant 0 : i32
    %c0_i32_1 = arith.constant 0 : i32
    %c0_i32_2 = arith.constant 0 : i32
    return %c0_i32, %c0_i32_0, %c0_i32_1 : i32, i32, i32
  }
  func.func @transform_2(%arg0: i32, %arg1: memref<2xi32, #tpu.memory_space<smem>>, %arg2: memref<2xi32, #tpu.memory_space<smem>>) -> (i32, i32) {
    %c0_i32 = arith.constant 0 : i32
    %c0_i32_0 = arith.constant 0 : i32
    %c0_i32_1 = arith.constant 0 : i32
    return %c0_i32, %c0_i32_0 : i32, i32
  }
  func.func @transform_3(%arg0: i32, %arg1: memref<2xi32, #tpu.memory_space<smem>>, %arg2: memref<2xi32, #tpu.memory_space<smem>>) -> (i32, i32, i32) {
    %c0_i32 = arith.constant 0 : i32
    %c0_i32_0 = arith.constant 0 : i32
    %c0_i32_1 = arith.constant 0 : i32
    return %arg0, %c0_i32, %c0_i32_0 : i32, i32, i32
  }
  func.func @transform_4(%arg0: i32, %arg1: memref<2xi32, #tpu.memory_space<smem>>, %arg2: memref<2xi32, #tpu.memory_space<smem>>) -> (i32, i32, i32) {
    %c0_i32 = arith.constant 0 : i32
    %c0_i32_0 = arith.constant 0 : i32
    %c0_i32_1 = arith.constant 0 : i32
    return %arg0, %c0_i32, %c0_i32_0 : i32, i32, i32
  }
}

module attributes {stable_mosaic.version = 11 : i64} {
  func.func @_word_loss_kernel(%arg0: i32, %arg1: memref<2xi32, #tpu.memory_space<smem>>, %arg2: memref<2xi32, #tpu.memory_space<smem>>, %arg3: memref<1x8x128xf32, #tpu.memory_space<vmem>>, %arg4: memref<2x128x128xf32, #tpu.memory_space<vmem>>, %arg5: memref<2x128xf32, #tpu.memory_space<vmem>>, %arg6: memref<1x1x2xf32, #tpu.memory_space<vmem>>, %arg7: memref<1x8x128xf32, #tpu.memory_space<vmem>>) attributes {dimension_semantics = [#tpu.dimension_semantics<parallel>], iteration_bounds = array<i64: 2>, scalar_prefetch = 2 : i64, scratch_operands = 0 : i64, tpu.core_type = #tpu.core_type<tc>, window_params = [{transform_indices = @transform_0, window_bounds = array<i64: 1, 8, 128>}, {pipeline_mode = #tpu.pipeline_mode<synchronous>, transform_indices = @transform_1, window_bounds = array<i64: 2, 128, 128>}, {pipeline_mode = #tpu.pipeline_mode<synchronous>, transform_indices = @transform_2, window_bounds = array<i64: 2, 128>}, {transform_indices = @transform_3, window_bounds = array<i64: 1, 1, 2>}, {transform_indices = @transform_4, window_bounds = array<i64: 1, 8, 128>}]} {
    %c0 = arith.constant 0 : index
    %c0_0 = arith.constant 0 : index
    %c0_1 = arith.constant 0 : index
    %0 = vector.load %arg3[%c0, %c0_0, %c0_1] : memref<1x8x128xf32, #tpu.memory_space<vmem>>, vector<1x8x128xf32>
    %1 = vector.shape_cast %0 : vector<1x8x128xf32> to vector<8x128xf32>
    %c0_2 = arith.constant 0 : index
    %c0_3 = arith.constant 0 : index
    %c0_4 = arith.constant 0 : index
    %2 = vector.load %arg4[%c0_2, %c0_3, %c0_4] : memref<2x128x128xf32, #tpu.memory_space<vmem>>, vector<2x128x128xf32>
    %3 = arith.index_cast %arg0 : i32 to index
    %4 = memref.load %arg1[%3] : memref<2xi32, #tpu.memory_space<smem>>
    %5 = vector.shape_cast %1 : vector<8x128xf32> to vector<1x8x128xf32>
    %6 = vector.shape_cast %5 : vector<1x8x128xf32> to vector<1x8x128xf32>
    %7 = vector.broadcast %6 : vector<1x8x128xf32> to vector<2x8x128xf32>
    "tpu.trace_start"() <{level = 10 : i32, message = "btd,bid->bti"}> : () -> ()
    %cst = arith.constant dense<0.000000e+00> : vector<2x8x128xf32>
    %8 = tpu.matmul %7, %2, %cst {dimension_numbers = #tpu.dot_dimension_numbers<[2], [2], [1], [1], [0, 0, 0, 1, 1, 1], [0], [0]>} : vector<2x8x128xf32>, vector<2x128x128xf32>, vector<2x8x128xf32> -> vector<2x8x128xf32>
    "tpu.trace_stop"() : () -> ()
    %9 = tpu.iota {dimensions = array<i32: 1>} : vector<1x8x1xi32>
    %10 = vector.broadcast %4 : i32 to vector<1x8x1xi32>
    %11 = arith.cmpi sge, %9, %10 : vector<1x8x1xi32>
    %c0_5 = arith.constant 0 : index
    %c0_6 = arith.constant 0 : index
    %12 = vector.load %arg5[%c0_5, %c0_6] : memref<2x128xf32, #tpu.memory_space<vmem>>, vector<2x128xf32>
    %cst_7 = arith.constant 5.000000e-01 : f32
    %13 = vector.broadcast %cst_7 : f32 to vector<2x128xf32>
    %14 = arith.cmpf olt, %12, %13 : vector<2x128xf32>
    %15 = vector.shape_cast %14 : vector<2x128xi1> to vector<2x1x128xi1>
    %16 = vector.broadcast %11 : vector<1x8x1xi1> to vector<2x8x128xi1>
    %17 = vector.broadcast %15 : vector<2x1x128xi1> to vector<2x8x128xi1>
    %18 = arith.ori %16, %17 : vector<2x8x128xi1>
    %cst_8 = arith.constant 0xFF800000 : f32
    %19 = vector.broadcast %cst_8 : f32 to vector<2x8x128xf32>
    %20 = arith.select %18, %19, %8 : vector<2x8x128xi1>, vector<2x8x128xf32>
    %cst_9 = arith.constant 4.000000e+00 : f32
    %21 = vector.broadcast %cst_9 : f32 to vector<2x8x128xf32>
    %22 = arith.mulf %20, %21 : vector<2x8x128xf32>
    %23 = math.exp %22 : vector<2x8x128xf32>
    %cst_10 = arith.constant dense<0.000000e+00> : vector<2x8xf32>
    %24 = vector.multi_reduction <add>, %23, %cst_10 [2] : vector<2x8x128xf32> to vector<2x8xf32>
    %25 = vector.shape_cast %24 : vector<2x8xf32> to vector<2x8x1xf32>
    %cst_11 = arith.constant 9.99999997E-7 : f32
    %26 = vector.broadcast %cst_11 : f32 to vector<2x8x1xf32>
    %27 = arith.addf %25, %26 : vector<2x8x1xf32>
    %28 = vector.broadcast %27 : vector<2x8x1xf32> to vector<2x8x128xf32>
    %29 = arith.divf %23, %28 : vector<2x8x128xf32>
    "tpu.trace_start"() <{level = 10 : i32, message = "bti,bid->btd"}> : () -> ()
    %cst_12 = arith.constant dense<0.000000e+00> : vector<2x8x128xf32>
    %30 = tpu.matmul %29, %2, %cst_12 {dimension_numbers = #tpu.dot_dimension_numbers<[2], [1], [1], [2], [0, 0, 0, 1, 1, 2], [0], [0]>} : vector<2x8x128xf32>, vector<2x128x128xf32>, vector<2x8x128xf32> -> vector<2x8x128xf32>
    "tpu.trace_stop"() : () -> ()
    %31 = arith.mulf %30, %30 : vector<2x8x128xf32>
    %cst_13 = arith.constant dense<0.000000e+00> : vector<2x8xf32>
    %32 = vector.multi_reduction <add>, %31, %cst_13 [2] : vector<2x8x128xf32> to vector<2x8xf32>
    %33 = vector.shape_cast %32 : vector<2x8xf32> to vector<2x8x1xf32>
    %cst_14 = arith.constant 9.99999997E-7 : f32
    %cst_15 = arith.constant 9.99999997E-7 : f32
    %34 = arith.mulf %cst_14, %cst_15 : f32
    %35 = vector.broadcast %34 : f32 to vector<2x8x1xf32>
    %36 = arith.maximumf %33, %35 : vector<2x8x1xf32>
    %37 = math.rsqrt %36 : vector<2x8x1xf32>
    %38 = vector.broadcast %37 : vector<2x8x1xf32> to vector<2x8x128xf32>
    %39 = arith.mulf %30, %38 : vector<2x8x128xf32>
    %40 = vector.shape_cast %1 : vector<8x128xf32> to vector<1x8x128xf32>
    %41 = vector.broadcast %40 : vector<1x8x128xf32> to vector<2x8x128xf32>
    %42 = arith.mulf %41, %39 : vector<2x8x128xf32>
    %cst_16 = arith.constant dense<0.000000e+00> : vector<2x8xf32>
    %43 = vector.multi_reduction <add>, %42, %cst_16 [2] : vector<2x8x128xf32> to vector<2x8xf32>
    %44 = tpu.iota {dimensions = array<i32: 1>} : vector<1x8xi32>
    %45 = vector.broadcast %4 : i32 to vector<1x8xi32>
    %46 = arith.cmpi sge, %44, %45 : vector<1x8xi32>
    %cst_17 = arith.constant 0xFF800000 : f32
    %47 = vector.shape_cast %46 : vector<1x8xi1> to vector<1x8xi1>
    %48 = vector.broadcast %47 : vector<1x8xi1> to vector<2x8xi1>
    %49 = vector.broadcast %cst_17 : f32 to vector<2x8xf32>
    %50 = arith.select %48, %49, %43 : vector<2x8xi1>, vector<2x8xf32>
    %cst_18 = arith.constant 5.000000e+00 : f32
    %51 = vector.broadcast %cst_18 : f32 to vector<2x8xf32>
    %52 = arith.mulf %50, %51 : vector<2x8xf32>
    %53 = math.exp %52 : vector<2x8xf32>
    %cst_19 = arith.constant dense<0.000000e+00> : vector<2xf32>
    %54 = vector.multi_reduction <add>, %53, %cst_19 [1] : vector<2x8xf32> to vector<2xf32>
    %55 = math.log %54 : vector<2xf32>
    %cst_20 = arith.constant 2.000000e-01 : f32
    %56 = vector.broadcast %cst_20 : f32 to vector<2xf32>
    %57 = arith.mulf %55, %56 : vector<2xf32>
    %58 = vector.shape_cast %57 : vector<2xf32> to vector<1x2xf32>
    %c0_21 = arith.constant 0 : index
    %c0_22 = arith.constant 0 : index
    %c0_23 = arith.constant 0 : index
    %59 = vector.load %arg6[%c0_21, %c0_22, %c0_23] : memref<1x1x2xf32, #tpu.memory_space<vmem>>, vector<1x1x2xf32>
    %60 = vector.shape_cast %59 : vector<1x1x2xf32> to vector<1x2xf32>
    %61 = vector.shape_cast %58 : vector<1x2xf32> to vector<1x1x2xf32>
    tpu.vector_store %arg6[%c0_21, %c0_22, %c0_23], %61 {strides = array<i32>} : memref<1x1x2xf32, #tpu.memory_space<vmem>>, vector<1x1x2xf32>,
    %62 = arith.index_cast %arg0 : i32 to index
    %c0_24 = arith.constant 0 : index
    %c0_25 = arith.constant 0 : index
    %63 = vector.load %arg4[%62, %c0_24, %c0_25] : memref<2x128x128xf32, #tpu.memory_space<vmem>>, vector<1x128x128xf32>
    %64 = vector.shape_cast %63 : vector<1x128x128xf32> to vector<128x128xf32>
    "tpu.trace_start"() <{level = 10 : i32, message = "td,id->ti"}> : () -> ()
    %cst_26 = arith.constant dense<0.000000e+00> : vector<8x128xf32>
    %65 = tpu.matmul %1, %64, %cst_26 {dimension_numbers = #tpu.dot_dimension_numbers<[1], [1], [0], [0], [0, 0, 1, 0], [], []>} : vector<8x128xf32>, vector<128x128xf32>, vector<8x128xf32> -> vector<8x128xf32>
    "tpu.trace_stop"() : () -> ()
    %66 = tpu.iota {dimensions = array<i32: 0>} : vector<8x1xi32>
    %67 = vector.broadcast %4 : i32 to vector<8x1xi32>
    %68 = arith.cmpi sge, %66, %67 : vector<8x1xi32>
    %69 = tpu.iota {dimensions = array<i32: 1>} : vector<1x128xi32>
    %70 = arith.index_cast %arg0 : i32 to index
    %71 = memref.load %arg2[%70] : memref<2xi32, #tpu.memory_space<smem>>
    %72 = vector.broadcast %71 : i32 to vector<1x128xi32>
    %73 = arith.cmpi sge, %69, %72 : vector<1x128xi32>
    %74 = vector.broadcast %68 : vector<8x1xi1> to vector<8x128xi1>
    %75 = vector.broadcast %73 : vector<1x128xi1> to vector<8x128xi1>
    %76 = arith.ori %74, %75 : vector<8x128xi1>
    %cst_27 = arith.constant 0xFF800000 : f32
    %77 = vector.broadcast %cst_27 : f32 to vector<8x128xf32>
    %78 = arith.select %76, %77, %65 : vector<8x128xi1>, vector<8x128xf32>
    %cst_28 = arith.constant 4.000000e+00 : f32
    %79 = vector.broadcast %cst_28 : f32 to vector<8x128xf32>
    %80 = arith.mulf %78, %79 : vector<8x128xf32>
    %81 = math.exp %80 : vector<8x128xf32>
    %cst_29 = arith.constant dense<0.000000e+00> : vector<8xf32>
    %82 = vector.multi_reduction <add>, %81, %cst_29 [1] : vector<8x128xf32> to vector<8xf32>
    %83 = vector.shape_cast %82 : vector<8xf32> to vector<8x1xf32>
    %cst_30 = arith.constant 9.99999997E-7 : f32
    %84 = vector.broadcast %cst_30 : f32 to vector<8x1xf32>
    %85 = arith.addf %83, %84 : vector<8x1xf32>
    %86 = vector.broadcast %85 : vector<8x1xf32> to vector<8x128xf32>
    %87 = arith.divf %81, %86 : vector<8x128xf32>
    %c0_31 = arith.constant 0 : index
    %c0_32 = arith.constant 0 : index
    %c0_33 = arith.constant 0 : index
    %88 = vector.load %arg7[%c0_31, %c0_32, %c0_33] : memref<1x8x128xf32, #tpu.memory_space<vmem>>, vector<1x8x128xf32>
    %89 = vector.shape_cast %88 : vector<1x8x128xf32> to vector<8x128xf32>
    %90 = vector.shape_cast %87 : vector<8x128xf32> to vector<1x8x128xf32>
    tpu.vector_store %arg7[%c0_31, %c0_32, %c0_33], %90 {strides = array<i32>} : memref<1x8x128xf32, #tpu.memory_space<vmem>>, vector<1x8x128xf32>,
    return
  }
  func.func @transform_0(%arg0: i32, %arg1: memref<2xi32, #tpu.memory_space<smem>>, %arg2: memref<2xi32, #tpu.memory_space<smem>>) -> (i32, i32, i32) {
    %c0_i32 = arith.constant 0 : i32
    %c0_i32_0 = arith.constant 0 : i32
    %c0_i32_1 = arith.constant 0 : i32
    return %arg0, %c0_i32, %c0_i32_0 : i32, i32, i32
  }
  func.func @transform_1(%arg0: i32, %arg1: memref<2xi32, #tpu.memory_space<smem>>, %arg2: memref<2xi32, #tpu.memory_space<smem>>) -> (i32, i32, i32) {
    %c0_i32 = arith.constant 0 : i32
    %c0_i32_0 = arith.constant 0 : i32
    %c0_i32_1 = arith.constant 0 : i32
    %c0_i32_2 = arith.constant 0 : i32
    return %c0_i32, %c0_i32_0, %c0_i32_1 : i32, i32, i32
  }
  func.func @transform_2(%arg0: i32, %arg1: memref<2xi32, #tpu.memory_space<smem>>, %arg2: memref<2xi32, #tpu.memory_space<smem>>) -> (i32, i32) {
    %c0_i32 = arith.constant 0 : i32
    %c0_i32_0 = arith.constant 0 : i32
    %c0_i32_1 = arith.constant 0 : i32
    return %c0_i32, %c0_i32_0 : i32, i32
  }
  func.func @transform_3(%arg0: i32, %arg1: memref<2xi32, #tpu.memory_space<smem>>, %arg2: memref<2xi32, #tpu.memory_space<smem>>) -> (i32, i32, i32) {
    %c0_i32 = arith.constant 0 : i32
    %c0_i32_0 = arith.constant 0 : i32
    %c0_i32_1 = arith.constant 0 : i32
    return %arg0, %c0_i32, %c0_i32_0 : i32, i32, i32
  }
  func.func @transform_4(%arg0: i32, %arg1: memref<2xi32, #tpu.memory_space<smem>>, %arg2: memref<2xi32, #tpu.memory_space<smem>>) -> (i32, i32, i32) {
    %c0_i32 = arith.constant 0 : i32
    %c0_i32_0 = arith.constant 0 : i32
    %c0_i32_1 = arith.constant 0 : i32
    return %arg0, %c0_i32, %c0_i32_0 : i32, i32, i32
  }
}

</mosaic_0001>

<bundles_post_ra>
// kernel: tpu_custom_call.1
= control target key start
LH: loop header
LB: loop body
LE: loop exit
PB: predicated region body
PF: predicated region fallthrough
CT: control target
= control target key end

     0   :  { %s999_s27 = smov [#allocation3]   ;;  %s1000_s28 = smov [#allocation4]   ;;  %s1262_s0 = inlined_call_operand.hbm [shape: s32[2], index: 0, kind: input, shape index: {}]   ;;  %s1263_s2 = inlined_call_operand.hbm [shape: f32[2,8,128], index: 2, kind: input, shape index: {}]   ;;  %s1264_s3 = inlined_call_operand.hbm [shape: f32[2,128,128], index: 3, kind: input, shape index: {}]   ;;  %s1265_s4 = inlined_call_operand.vmem [shape: f32[2,128], index: 4, kind: input, shape index: {}]   ;;  %s1266_s5 = inlined_call_operand.hbm [shape: f32[2,1,2], index: 5, kind: output, shape index: {0}]   ;;  %s1267_s6 = inlined_call_operand.hbm [shape: f32[2,8,128], index: 6, kind: output, shape index: {1}]   ;;  %s1268_s1 = inlined_call_operand.hbm [shape: s32[2], index: 1, kind: input, shape index: {}]  }
   0x1   :  { %s13_s23 = sshll.u32 %s1262_s0, 4  ;;  %s18_s26 = sshll.u32 %s1268_s1, 4  ;;  %s14_s23 = int_to_ptr.hbm [resolvable:$true] %s13_s23  ;;  %s19_s26 = int_to_ptr.hbm [resolvable:$true] %s18_s26 }
   0x2   :  { %16 = dma.hbm_to_smem %s14_s23, 16, %s999_s27, [#allocation2] }
   0x3   :  { %21 = dma.hbm_to_smem %s19_s26, 16, %s1000_s28, [#allocation2] }
   0x4   :  { %965 = dma.done.wait [#allocation2], 32 }
   0x5   :  { %966 = vsyncadd [#allocation2], 4294967264 }
   0x6   :  { %24 = sfence }
   0x7   :  { %25 = vsyncpa [#allocation6], 0 }
   0x8   :  { %27 = vsyncpa [#allocation6 + $0x1], 0 }
   0x9   :  { %28 = vsyncpa [#allocation9], 0 }
   0xa   :  { %29 = vsyncpa [#allocation7], 0 }
   0xb   :  { %31 = vsyncpa [#allocation7 + $0x1], 0 }
   0xc   :  { %32 = vsyncpa [#allocation12], 0 }
   0xd   :  { %34 = vsyncpa [#allocation12 + $0x1], 0  ;;  %s1046_s0 = smov 0   ;;  %s1048_s29 = smov 0  }
   0xe   :  { %s1050_s1 = smov 0   ;;  %s1052_s30 = smov 0  }
   0xf LB: > { %s176_s9 = sshll.u32 %s1264_s3, 4  ;;  %s1070_s10 = sadd.s32 4294967295, %s997_s30   ;;  %s997_s30 = sphi %s1052_s30, %s1280_s30   ;;  %s993_s1 = sphi %s1050_s1, %s1279_s1   ;;  %s989_s29 = sphi %s1048_s29, %s1278_s29   ;;  %s985_s0 = sphi %s1046_s0, %s1277_s0   ;;  %s177_s9 = int_to_ptr.hbm [resolvable:$true] %s176_s9 }
  0x10   : > { %p708_p0 = scmp.ge.s32.totalorder %s997_s30, 1  ;;  %p61_p1 = scmp.eq.s32.totalorder %s1070_s10, 0 }
  0x11   : > { %p165_p2 = scmp.lt.s32.totalorder %s997_s30, 3  ;;  %s1001_s12 = smov [#allocation8]  }
  0x12   : > { %s178_s13 = sshll.u32 %s1001_s12, 4  ;;  %s1002_s14 = smov 128   ;;  %s179_s13 = int_to_ptr.vmem [resolvable:$true] %s178_s13 }
  0x13   : > { %p1075_p3 = pnand %p708_p0, %p165_p2  ;;  %s1003_s15 = smov 8  }
  0x14   : > { %s707_s16 = sadd.s32 4294967294, %s997_s30   ;;  %s1086_s17 = sadd.s32 1, %s997_s30  }
  0x15   : > { %p732_p4 = pneg %p1075_p3  ;;  %s47_s18 = sadd.s32 1, %s993_s1 }
  0x16   : > { %s44_s19 = ssub.s32 %s997_s30, %s1086_s17  ;;  %p54_p7 = scmp.ne.s32.totalorder %s993_s1, %s989_s29 }
  0x17   : > { %p733_p6 = pnand %p732_p4, %p61_p1  ;;  %p45_p8 = scmp.eq.s32.totalorder %s44_s19, 0 }
  0x18   : > { %p55_p9 = scmp.eq.s32.totalorder %s997_s30, 0  ;;  %p60_p10 = scmp.ne.s32.totalorder %s989_s29, %s985_s0 }
  0x19   : > { %735 = dma.hbm_to_vmem [thread:$0]  (!%p733_p6), %s177_s9, 4096, %s179_s13, [#allocation9], %s1002_s14, %s1002_s14, %s1003_s15  }
  0x1a   : > { %p126_p11 = scmp.eq.s32.totalorder %s1070_s10, 1  ;;  %p1102_p12 = por %p61_p1, %p60_p10 }
  0x1b   : > { %s1098_s20 = scalar_select %p45_p8, %s993_s1, %s47_s18  }
  0x1c   : > { %p1106_p13 = por %p126_p11, %p54_p7  ;;  %p132_p0 = scmp.eq.s32.totalorder %s707_s16, 1 }
  0x1d   : > { %p56_p2 = por %p55_p9, %p54_p7  ;;  %s195_s23 = sand.u32 1, %s993_s1  }
  0x1e   : > { %p1111_p4 = por %p132_p0, %p60_p10  ;;  %p748_p6 = scmp.lt.s32.totalorder %s997_s30, 2 }
  0x1f   : > { %s711_s25 = sshll.u32 %s195_s23, 3  ;;  %s712_s26 = sshll.u32 %s997_s30, 3 }
  0x20   : > { %s203_s7 = scalar_lea.hbm %s1263_s2, %s712_s26  ;;  %s199_s9 = scalar_lea.vmem [#allocation5], %s711_s25 }
  0x21   : > { %s205_s8 = sshll.u32 %s203_s7, 4  ;;  %s207_s12 = sshll.u32 %s199_s9, 4  ;;  %s206_s8 = int_to_ptr.hbm [resolvable:$true] %s205_s8  ;;  %s208_s12 = int_to_ptr.vmem [resolvable:$true] %s207_s12 }
  0x22   : > { %p1120_p8 = pnand %p748_p6, %p56_p2  ;;  %s196_s14 = scalar_lea.sflag [#allocation6], %s195_s23 }
  0x23   : > { %s863_s15 = sshra.s32 %s206_s8, 4  ;;  %s870_s25 = scalar_lea.hbm %s1263_s2, 16  ;;  %s864_s15 = int_to_ptr.hbm [resolvable:$true] %s863_s15 }
  0x24   : > { %s865_s16 = scalar_lea.hbm %s864_s15, 8  ;;  %p867_p9 = pneg %p1120_p8 }
  0x25   : > { %p866_p7 = scmp.ne.s32.totalorder %s864_s15, %s865_s16  ;;  %p871_p0 = scmp.lt.s32.totalorder %s864_s15, %s1263_s2 }
  0x26   : > { %p872_p2 = scmp.lt.s32.totalorder %s870_s25, %s865_s16 }
  0x27   : > { %p868_p10 = pnand %p867_p9, %p866_p7 }
  0x28   : > { %p873_p6 = por %p872_p2, %p871_p0 }
  0x29   : > { %p869_p11 = pneg %p868_p10 }
  0x2b   : > { %p874_p5 = pnand %p873_p6, %p869_p11 }
  0x2d   : > { %877 = shalt.err (!%p874_p5)
}
  0x2e   : > { %739 = dma.hbm_to_vmem [thread:$0]  (!%p1120_p8), %s206_s8, 128, %s208_s12, %s196_s14  }
  0x2f   : > { %216 = sbr.rel (%p1075_p3) target bundleno = 940 (0x3ac), region = 32  ;;  %s1137_s23 = sand.u32 (!%p1075_p3), 1, %s989_s29  }
  0x30   : > { %s714_s28 = sshll.u32 (!%p1075_p3), %s1137_s23, 3  ;;  %s219_s7 = scalar_lea.sflag (!%p1075_p3), [#allocation6], %s1137_s23 }
  0x31   : > { %s1143_s9 = scalar_lea.vmem (!%p1075_p3), [#allocation5], %s714_s28 }
  0x34   : > { %968 = dma.done.wait (%p1102_p12), %s219_s7, 128  }
  0x35   : > { %970 = vsyncadd (%p1102_p12), %s219_s7, 4294967168 }
  0x36   : > { %972 = dma.done.wait (%p61_p1), [#allocation9], 4096  }
  0x37   : > { %974 = vsyncadd (%p61_p1), [#allocation9], 4294963200  ;;  %v273_v0 = vld [vmem:[#allocation8 + $0x78] sm:$0xff]  ;;  %v272_v2 = vld [vmem:[#allocation8 + $0x70] sm:$0xff]  ;;  %v1004_v34 = vmov 0   ;;  %s1162_s8 = sld [smem:[#allocation3 + %s1070_s10]]  ;;  %v331_v37 = vlaneseq }
  0x38   : > { %291 = vmatpush.xpose.msra.mxu0 %v273_v0  ;;  %v289_v1 = vld [vmem:[#allocation8 + $0xf8] sm:$0xff]  ;;  %393 = vmatpush.msra.mxu3 %v273_v0  ;;  %v288_v3 = vld [vmem:[#allocation8 + $0xf0] sm:$0xff]  ;;  %v271_v4 = vld [vmem:[#allocation8 + $0x68] sm:$0xff]  ;;  %s717_s12 = sshll.u32 %s1070_s10, 7  ;;  %s535_s14 = sld [smem:[#allocation4 + %s1070_s10]] }
  0x39   : > { %311 = vmatpush.xpose.msra.mxu1 %v289_v1  ;;  %v270_v5 = vld [vmem:[#allocation8 + $0x60] sm:$0xff]  ;;  %v287_v6 = vld [vmem:[#allocation8 + $0xe8] sm:$0xff]  ;;  %v269_v7 = vld [vmem:[#allocation8 + $0x58] sm:$0xff]  ;;  %v332_v39 = vshrl.u32 %v331_v37, 7  ;;  %s1177_s13 = scalar_lea.vmem [#allocation8], %s717_s12  ;;  %s256_s15 = scalar_lea.vmem [#allocation11], %s714_s28 }
  0x3a   : > { %394 = vmatpush.msra.mxu3 %v272_v2  ;;  %v268_v8 = vld [vmem:[#allocation8 + $0x50] sm:$0xff]  ;;  %v286_v9 = vld [vmem:[#allocation8 + $0xe0] sm:$0xff]  ;;  %v267_v10 = vld [vmem:[#allocation8 + $0x48] sm:$0xff]  ;;  %s719_s16 = sshll.u32 %s1070_s10, 3  ;;  %s594_s26 = sshll.u32 %s256_s15, 4  ;;  %s595_s26 = int_to_ptr.vmem [resolvable:$true] %s594_s26 }
  0x3b   : > { %v266_v11 = vld [vmem:[#allocation8 + $0x40] sm:$0xff]  ;;  %v285_v12 = vld [vmem:[#allocation8 + $0xd8] sm:$0xff]  ;;  %v264_v14 = vld [vmem:[#allocation8 + $0x30] sm:$0xff]  ;;  %s592_s25 = scalar_lea.hbm %s1267_s6, %s719_s16  ;;  %s569_s28 = scalar_lea.sflag [#allocation12], %s1137_s23 }
  0x3c   : > { %292 = vmatpush.xpose.msra.mxu0 %v272_v2  ;;  %395 = vmatpush.msra.mxu3 %v271_v4  ;;  %v265_v13 = vld [vmem:[#allocation8 + $0x38] sm:$0xff]  ;;  %v284_v15 = vld [vmem:[#allocation8 + $0xd0] sm:$0xff]  ;;  %v263_v16 = vld [vmem:[#allocation8 + $0x28] sm:$0xff]  ;;  %s596_s27 = sshll.u32 %s592_s25, 4  ;;  %s597_s27 = int_to_ptr.hbm [resolvable:$true] %s596_s27 }
  0x3d   : > { %312 = vmatpush.xpose.msra.mxu1 %v288_v3  ;;  %v262_v17 = vld [vmem:[#allocation8 + $0x20] sm:$0xff]  ;;  %v283_v18 = vld [vmem:[#allocation8 + $0xc8] sm:$0xff]  ;;  %v261_v19 = vld [vmem:[#allocation8 + $0x18] sm:$0xff]  ;;  %v333_v41 = vstv %s1162_s8  ;;  %s907_s7 = sshra.s32 %s597_s27, 4  ;;  %s913_s8 = scalar_lea.hbm %s1267_s6, 16  ;;  %s908_s7 = int_to_ptr.hbm [resolvable:$true] %s907_s7 }
  0x3e   : > { %396 = vmatpush.msra.mxu3 %v270_v5  ;;  %v260_v20 = vld [vmem:[#allocation8 + $0x10] sm:$0xff]  ;;  %v282_v21 = vld [vmem:[#allocation8 + $0xc0] sm:$0xff]  ;;  %v259_v22 = vld [vmem:[#allocation8 + $0x8] sm:$0xff]  ;;  %vm1168_vm2 = vcmp.ge.s32.totalorder %v332_v39, %v333_v41  ;;  %v536_v39 = vstv %s535_s14  ;;  %p914_p12 = scmp.lt.s32.totalorder %s908_s7, %s1267_s6 }
  0x3f   : > { %v258_v23 = vld [vmem:[#allocation8] sm:$0xff]  ;;  %v281_v24 = vld [vmem:[#allocation8 + $0xb8] sm:$0xff]  ;;  %v280_v25 = vld [vmem:[#allocation8 + $0xb0] sm:$0xff] }
  0x40   : > { %293 = vmatpush.xpose.msra.mxu0 %v271_v4  ;;  %397 = vmatpush.msra.mxu3 %v269_v7  ;;  %v279_v26 = vld [vmem:[#allocation8 + $0xa8] sm:$0xff]  ;;  %v278_v27 = vld [vmem:[#allocation8 + $0xa0] sm:$0xff]  ;;  %v277_v28 = vld [vmem:[#allocation8 + $0x98] sm:$0xff] }
  0x41   : > { %313 = vmatpush.xpose.msra.mxu1 %v287_v6  ;;  %v276_v29 = vld [vmem:[#allocation8 + $0x90] sm:$0xff]  ;;  %v275_v30 = vld [vmem:[#allocation8 + $0x88] sm:$0xff]  ;;  %v274_v31 = vld [vmem:[#allocation8 + $0x80] sm:$0xff] }
  0x42   : > { %398 = vmatpush.msra.mxu3 %v268_v8  ;;  %v1154_v32 = vld [vmem:[%s1143_s9] sm:$0xff]  ;;  %v335_v33 = vld [vmem:[%s1265_s4] sm:$0x3]  ;;  %v514_v54 = vld [vmem:[%s1177_s13 + $0x78] sm:$0xff]  ;;  %s909_s9 = scalar_lea.hbm %s908_s7, 8 }
  0x43   : > { %vm336_vm0 = vcmp.lt.f32.partialorder %v335_v33, 0.5  ;;  %515 = vmatpush.xpose.msra.mxu2 %v514_v54  ;;  %v513_v56 = vld [vmem:[%s1177_s13 + $0x70] sm:$0xff]  ;;  %v512_v58 = vld [vmem:[%s1177_s13 + $0x68] sm:$0xff]  ;;  %v511_v60 = vld [vmem:[%s1177_s13 + $0x60] sm:$0xff]  ;;  %p910_p1 = scmp.ne.s32.totalorder %s908_s7, %s909_s9  ;;  %p915_p8 = scmp.lt.s32.totalorder %s913_s8, %s909_s9 }
  0x44   : > { %294 = vmatpush.xpose.msra.mxu0 %v270_v5  ;;  %399 = vmatpush.msra.mxu3 %v267_v10  ;;  %v337_v35 = vsel %vm336_vm0, 1, %v1004_v34 }
  0x45   : > { %314 = vmatpush.xpose.msra.mxu1 %v286_v9  ;;  %v338_v36 = vrot.slane %v337_v35, 1  ;;  %v343_v40 = vperm.slane %v337_v35, 0  ;;  %p911_p3 = pnand %p910_p1, %p1106_p13  ;;  %p916_p7 = por %p915_p8, %p914_p12 }
  0x46   : > { %400 = vmatpush.msra.mxu3 %v266_v11 }
  0x47   : > { %vm339_vm1 = vcmp.ne.s32.totalorder %v338_v36, 0  ;;  %vm345_vm3 = vcmp.eq.s32.totalorder %v343_v40, 1  ;;  %516 = vmatpush.xpose.msra.mxu2 %v513_v56  ;;  %p912_p5 = pneg %p911_p3 }
  0x48   : > { %295 = vmatpush.xpose.msra.mxu0 %v269_v7  ;;  %401 = vmatpush.msra.mxu3 %v265_v13  ;;  %v342_v38 = vsel %vm339_vm1, 1, %v1004_v34  ;;  %vm347_vm5 = vmor %vm1168_vm2, %vm345_vm3 }
  0x49   : > { %315 = vmatpush.xpose.msra.mxu1 %v285_v12  ;;  %v344_v42 = vperm.slane %v342_v38, 0  ;;  %v1198_v38 = vand.u32 127, %v331_v37  ;;  %p917_p9 = pnand %p916_p7, %p912_p5 }
  0x4a   : > { %402 = vmatpush.msra.mxu3 %v264_v14 }
  0x4b   : > { %vm346_vm4 = vcmp.eq.s32.totalorder %v344_v42, 1  ;;  %517 = vmatpush.xpose.msra.mxu2 %v512_v58  ;;  %vm537_vm15 = vcmp.ge.s32.totalorder %v1198_v38, %v536_v39 }
  0x4c   : > { %296 = vmatpush.xpose.msra.mxu0 %v268_v8  ;;  %403 = vmatpush.msra.mxu3 %v263_v16  ;;  %vm348_vm6 = vmor %vm1168_vm2, %vm346_vm4 }
  0x4d   : > { %316 = vmatpush.xpose.msra.mxu1 %v284_v15  ;;  %vm540_vm0 = vmor %vm1168_vm2, %vm537_vm15 }
  0x4e   : > { %404 = vmatpush.msra.mxu3 %v262_v17 }
  0x4f   : > { %518 = vmatpush.xpose.msra.mxu2 %v511_v60 }
  0x50   : > { %297 = vmatpush.xpose.msra.mxu0 %v267_v10  ;;  %405 = vmatpush.msra.mxu3 %v261_v19 }
  0x51   : > { %317 = vmatpush.xpose.msra.mxu1 %v283_v18 }
  0x52   : > { %406 = vmatpush.msra.mxu3 %v260_v20 }
  0x54   : > { %298 = vmatpush.xpose.msra.mxu0 %v266_v11  ;;  %407 = vmatpush.msra.mxu3 %v259_v22 }
  0x55   : > { %318 = vmatpush.xpose.msra.mxu1 %v282_v21 }
  0x56   : > { %408 = vmatpush.msra.mxu3 %v258_v23 }
  0x58   : > { %413 = vmatpush.msrb.mxu3 %v289_v1  ;;  %299 = vmatpush.xpose.msra.mxu0 %v265_v13  ;;  %v510_v1 = vld [vmem:[%s1177_s13 + $0x58] sm:$0xff] }
  0x59   : > { %319 = vmatpush.xpose.msra.mxu1 %v281_v24  ;;  %519 = vmatpush.xpose.msra.mxu2 %v510_v1 }
  0x5a   : > { %414 = vmatpush.msrb.mxu3 %v288_v3 }
  0x5c   : > { %415 = vmatpush.msrb.mxu3 %v287_v6  ;;  %300 = vmatpush.xpose.msra.mxu0 %v264_v14  ;;  %v509_v6 = vld [vmem:[%s1177_s13 + $0x50] sm:$0xff]  ;;  %v508_v14 = vld [vmem:[%s1177_s13 + $0x48] sm:$0xff] }
  0x5d   : > { %320 = vmatpush.xpose.msra.mxu1 %v280_v25  ;;  %520 = vmatpush.xpose.msra.mxu2 %v509_v6 }
  0x5e   : > { %416 = vmatpush.msrb.mxu3 %v286_v9 }
  0x60   : > { %417 = vmatpush.msrb.mxu3 %v285_v12  ;;  %301 = vmatpush.xpose.msra.mxu0 %v263_v16 }
  0x61   : > { %321 = vmatpush.xpose.msra.mxu1 %v279_v26  ;;  %521 = vmatpush.xpose.msra.mxu2 %v508_v14 }
  0x62   : > { %418 = vmatpush.msrb.mxu3 %v284_v15 }
  0x64   : > { %419 = vmatpush.msrb.mxu3 %v283_v18  ;;  %302 = vmatpush.xpose.msra.mxu0 %v262_v17 }
  0x65   : > { %322 = vmatpush.xpose.msra.mxu1 %v278_v27 }
  0x66   : > { %420 = vmatpush.msrb.mxu3 %v282_v21 }
  0x68   : > { %421 = vmatpush.msrb.mxu3 %v281_v24  ;;  %303 = vmatpush.xpose.msra.mxu0 %v261_v19  ;;  %v507_v19 = vld [vmem:[%s1177_s13 + $0x40] sm:$0xff]  ;;  %v506_v24 = vld [vmem:[%s1177_s13 + $0x38] sm:$0xff] }
  0x69   : > { %323 = vmatpush.xpose.msra.mxu1 %v277_v28  ;;  %522 = vmatpush.xpose.msra.mxu2 %v507_v19 }
  0x6a   : > { %422 = vmatpush.msrb.mxu3 %v280_v25  ;;  %v505_v25 = vld [vmem:[%s1177_s13 + $0x30] sm:$0xff] }
  0x6c   : > { %423 = vmatpush.msrb.mxu3 %v279_v26  ;;  %304 = vmatpush.xpose.msra.mxu0 %v260_v20  ;;  %v504_v26 = vld [vmem:[%s1177_s13 + $0x28] sm:$0xff] }
  0x6d   : > { %324 = vmatpush.xpose.msra.mxu1 %v276_v29  ;;  %523 = vmatpush.xpose.msra.mxu2 %v506_v24 }
  0x6e   : > { %424 = vmatpush.msrb.mxu3 %v278_v27  ;;  %v503_v27 = vld [vmem:[%s1177_s13 + $0x20] sm:$0xff] }
  0x70   : > { %425 = vmatpush.msrb.mxu3 %v277_v28  ;;  %305 = vmatpush.xpose.msra.mxu0 %v259_v22  ;;  %v502_v28 = vld [vmem:[%s1177_s13 + $0x18] sm:$0xff] }
  0x71   : > { %325 = vmatpush.xpose.msra.mxu1 %v275_v30  ;;  %524 = vmatpush.xpose.msra.mxu2 %v505_v25 }
  0x72   : > { %426 = vmatpush.msrb.mxu3 %v276_v29  ;;  %v501_v29 = vld [vmem:[%s1177_s13 + $0x10] sm:$0xff] }
  0x74   : > { %427 = vmatpush.msrb.mxu3 %v275_v30  ;;  %306 = vmatpush.xpose.msra.mxu0 %v258_v23  ;;  %v500_v30 = vld [vmem:[%s1177_s13 + $0x8] sm:$0xff] }
  0x75   : > { %326 = vmatpush.xpose.msra.mxu1 %v274_v31  ;;  %525 = vmatpush.xpose.msra.mxu2 %v504_v26 }
  0x76   : > { %428 = vmatpush.msrb.mxu3 %v274_v31  ;;  %v499_v31 = vld [vmem:[%s1177_s13] sm:$0xff] }
  0x77   : > { %307 = vmatmul.f32.vlgmr.msra.gmra.mxu0 %v1154_v32 }
  0x78   : > { %327 = vmatmul.f32.vlgmr.msra.gmra.mxu1 %v1154_v32 }
  0x79   : > { %526 = vmatpush.xpose.msra.mxu2 %v503_v27 }
  0x7d   : > { %527 = vmatpush.xpose.msra.mxu2 %v502_v28 }
  0x81   : > { %528 = vmatpush.xpose.msra.mxu2 %v501_v29 }
  0x85   : > { %529 = vmatpush.xpose.msra.mxu2 %v500_v30 }
  0x89   : > { %530 = vmatpush.xpose.msra.mxu2 %v499_v31 }
  0x8c   : > { %531 = vmatmul.f32.vlgmr.msra.gmra.mxu2 %v1154_v32 }
  0xf4   : > { %v308_v44 = vpop.f32.mrf.mxu0 }
  0xf5   : > { %v349_v45 = vsel %vm347_vm5, -inf, %v308_v44  ;;  %v328_v46 = vpop.f32.mrf.mxu1 }
  0xf6   : > { %v351_v47 = vmul.f32 4.0, %v349_v45  ;;  %v350_v48 = vsel %vm348_vm6, -inf, %v328_v46 }
  0xf7   : > { %v352_v50 = vmul.f32 4.0, %v350_v48 }
  0xf8   : > { %v353_v49 = vmul.f32 1.442695, %v351_v47 }
  0xf9   : > { %v355_v51 = vmul.f32 1.442695, %v352_v50 }
  0xfa   : > { %789 = vpow2.f32 %v353_v49 }
  0xfb   : > { %791 = vpow2.f32 %v355_v51 }
 0x100   : > { %v790_v52 = vpop.eup %789 }
 0x101   : > { %357 = vadd.xlane.f32.xlu0 %v790_v52  ;;  %v792_v53 = vpop.eup %791 }
 0x109   : > { %359 = vadd.xlane.f32.xlu0 %v792_v53 }
 0x10f   : > { %v532_v40 = vpop.f32.mrf.mxu2 }
 0x110   : > { %v541_v42 = vsel %vm540_vm0, -inf, %v532_v40 }
 0x111   : > { %v542_v44 = vmul.f32 4.0, %v541_v42 }
 0x113   : > { %v543_v45 = vmul.f32 1.442695, %v542_v44 }
 0x174   : > { %v358_v55 = vpop.xlane.xlu0 %357 }
 0x175   : > { %v361_v57 = vadd.f32 1e-06, %v358_v55 }
 0x177   : > { %793 = vrcp.f32 %v361_v57  ;;  %v374_v2 = vand.u32 2147483648, %v361_v57  ;;  %v372_v4 = vand.u32 2147483647, %v361_v57  ;;  %vm368_vm8 = vweird.f32 %v361_v57 }
 0x179   : > { %v375_v8 = vor.u32 1.1754944e-38, %v374_v2  ;;  %vm373_vm10 = vcmp.eq.f32.partialorder %v372_v4, 8.507059e+37 }
 0x17c   : > { %v360_v59 = vpop.xlane.xlu0 %359 }
 0x17d   : > { %v794_v61 = vpop.eup %793  ;;  %v362_v62 = vadd.f32 1e-06, %v360_v59 }
 0x17e   : > { %v364_v63 = vmul.f32 %v794_v61, %v361_v57  ;;  %vm369_vm7 = vweird.f32 %v794_v61 }
 0x17f   : > { %795 = vrcp.f32 %v362_v62  ;;  %vm370_vm9 = vmor %vm368_vm8, %vm369_vm7  ;;  %v389_v15 = vand.u32 2147483648, %v362_v62  ;;  %v387_v17 = vand.u32 2147483647, %v362_v62  ;;  %vm383_vm12 = vweird.f32 %v362_v62 }
 0x180   : > { %v365_v0 = vsub.f32 1.0, %v364_v63  ;;  %797 = vpow2.f32 %v543_v45 }
 0x181   : > { %v390_v20 = vor.u32 1.1754944e-38, %v389_v15  ;;  %vm388_vm14 = vcmp.eq.f32.partialorder %v387_v17, 8.507059e+37 }
 0x182   : > { %v366_v3 = vmul.f32 %v794_v61, %v365_v0 }
 0x184   : > { %v367_v5 = vadd.f32 %v794_v61, %v366_v3 }
 0x185   : > { %v796_v7 = vpop.eup %795 }
 0x186   : > { %v379_v9 = vmul.f32 %v796_v7, %v362_v62  ;;  %v371_v10 = vsel %vm370_vm9, %v794_v61, %v367_v5  ;;  %vm384_vm11 = vweird.f32 %v796_v7  ;;  %v798_v46 = vpop.eup %797 }
 0x187   : > { %v376_v11 = vsel %vm373_vm10, %v375_v8, %v371_v10  ;;  %vm385_vm13 = vmor %vm383_vm12, %vm384_vm11  ;;  %545 = vadd.xlane.f32.xlu0 %v798_v46  ;;  %vm478_vm11 = vcmask 1041409   ;;  %vm471_vm12 = vcmp.ge.s32.totalorder %v1198_v38, %v333_v41 }
 0x188   : > { %v380_v12 = vsub.f32 1.0, %v379_v9  ;;  %v377_v13 = vmul.f32 %v790_v52, %v376_v11 }
 0x18a   : > { %409 = vmatmul.f32.vlgmr.msra.gmra.mxu3 %v377_v13  ;;  %v381_v16 = vmul.f32 %v796_v7, %v380_v12 }
 0x18c   : > { %v382_v18 = vadd.f32 %v796_v7, %v381_v16 }
 0x18e   : > { %v386_v21 = vsel %vm385_vm13, %v796_v7, %v382_v18  ;;  %vm485_vm13 = vcmask 58368  }
 0x18f   : > { %v391_v22 = vsel %vm388_vm14, %v390_v20, %v386_v21 }
 0x190   : > { %v392_v23 = vmul.f32 %v792_v53, %v391_v22 }
 0x192   : > { %429 = vmatmul.f32.vlgmr.msrb.gmra.mxu3 %v392_v23 }
 0x1fa   : > { %v546_v3 = vpop.xlane.xlu0 %545 }
 0x1fb   : > { %v547_v4 = vadd.f32 1e-06, %v546_v3 }
 0x1fd   : > { %v559_v7 = vand.u32 2147483648, %v547_v4  ;;  %vm553_vm7 = vweird.f32 %v547_v4  ;;  %v557_v9 = vand.u32 2147483647, %v547_v4 }
 0x1ff   : > { %v560_v11 = vor.u32 1.1754944e-38, %v559_v7  ;;  %vm558_vm10 = vcmp.eq.f32.partialorder %v557_v9, 8.507059e+37 }
 0x20d   : > { %v410_v33 = vpop.f32.mrf.mxu3 }
 0x20e   : > { %v433_v34 = vmul.f32 %v410_v33, %v410_v33 }
 0x210   : > { %435 = vadd.xlane.f32.xlu1 %v433_v34 }
 0x215   : > { %v430_v35 = vpop.f32.mrf.mxu3 }
 0x216   : > { %v434_v36 = vmul.f32 %v430_v35, %v430_v35 }
 0x218   : > { %437 = vadd.xlane.f32.xlu1 %v434_v36 }
 0x283   : > { %v436_v47 = vpop.xlane.xlu1 %435 }
 0x284   : > { %v439_v48 = vmax.f32 %v436_v47, 1e-12 }
 0x286   : > { %799 = vrsqrt.f32 %v439_v48  ;;  %vm447_vm2 = vweird.f32 %v439_v48 }
 0x28b   : > { %v438_v49 = vpop.xlane.xlu1 %437 }
 0x28c   : > { %v800_v50 = vpop.eup %799  ;;  %v440_v37 = vmax.f32 %v438_v49, 1e-12 }
 0x28d   : > { %v442_v51 = vmul.f32 %v800_v50, %v439_v48  ;;  %vm448_vm1 = vweird.f32 %v800_v50 }
 0x28e   : > { %801 = vrsqrt.f32 %v440_v37  ;;  %vm449_vm3 = vmor %vm447_vm2, %vm448_vm1  ;;  %vm457_vm5 = vweird.f32 %v440_v37 }
 0x28f   : > { %v443_v52 = vmul.f32 %v800_v50, %v442_v51  ;;  %803 = vrcp.f32 %v547_v4 }
 0x291   : > { %v444_v53 = vmul.f32 0.5, %v443_v52 }
 0x293   : > { %v445_v54 = vsub.f32 1.5, %v444_v53 }
 0x294   : > { %v802_v43 = vpop.eup %801 }
 0x295   : > { %v452_v55 = vmul.f32 %v802_v43, %v440_v37  ;;  %v446_v56 = vmul.f32 %v800_v50, %v445_v54  ;;  %vm458_vm4 = vweird.f32 %v802_v43  ;;  %v804_v5 = vpop.eup %803 }
 0x296   : > { %vm459_vm6 = vmor %vm457_vm5, %vm458_vm4  ;;  %v549_v6 = vmul.f32 %v804_v5, %v547_v4  ;;  %vm554_vm8 = vweird.f32 %v804_v5 }
 0x297   : > { %v453_v57 = vmul.f32 %v802_v43, %v452_v55  ;;  %v450_v58 = vsel %vm449_vm3, %v800_v50, %v446_v56  ;;  %vm555_vm9 = vmor %vm553_vm7, %vm554_vm8 }
 0x298   : > { %v461_v59 = vmul.f32 %v450_v58, %v410_v33  ;;  %v550_v8 = vsub.f32 1.0, %v549_v6 }
 0x299   : > { %v454_v60 = vmul.f32 0.5, %v453_v57 }
 0x29a   : > { %v463_v61 = vmul.f32 %v461_v59, %v1154_v32  ;;  %v551_v10 = vmul.f32 %v804_v5, %v550_v8 }
 0x29b   : > { %v455_v62 = vsub.f32 1.5, %v454_v60 }
 0x29c   : > { %465 = vadd.xlane.f32.xlu2 %v463_v61  ;;  %v552_v12 = vadd.f32 %v804_v5, %v551_v10 }
 0x29d   : > { %v456_v63 = vmul.f32 %v802_v43, %v455_v62 }
 0x29e   : > { %v556_v13 = vsel %vm555_vm9, %v804_v5, %v552_v12 }
 0x29f   : > { %v460_v0 = vsel %vm459_vm6, %v802_v43, %v456_v63 }
 0x2a0   : > { %v462_v1 = vmul.f32 %v460_v0, %v430_v35 }
 0x2a2   : > { %v464_v2 = vmul.f32 %v462_v1, %v1154_v32  ;;  %v561_v32 = vsel %vm558_vm10, %v560_v11, %v556_v13 }
 0x2a3   : > { %v562_v14 = vmul.f32 %v798_v46, %v561_v32 }
 0x2a4   : > { %467 = vadd.xlane.f32.xlu2 %v464_v2 }
 0x2a5   : > { %563 = vst [vmem:[%s256_s15] sm:$0xff] %v562_v14 }
 0x30f   : > { %v466_v15 = vpop.xlane.xlu2 %465 }
 0x310   : > { %v476_v17 = vperm.slane %v466_v15, %v1198_v38 }
 0x317   : > { %v468_v16 = vpop.xlane.xlu2 %467 }
 0x318   : > { %v477_v18 = vperm.slane %v468_v16, %v1198_v38 }
 0x31a   : > { %v479_v19 = vsel %vm478_vm11, %v477_v18, %v476_v17 }
 0x31b   : > { %v481_v20 = vsel %vm471_vm12, -inf, %v479_v19 }
 0x31c   : > { %v482_v21 = vmul.f32 5.0, %v481_v20 }
 0x31e   : > { %v483_v22 = vmul.f32 1.442695, %v482_v21 }
 0x320   : > { %805 = vpow2.f32 %v483_v22 }
 0x326   : > { %v806_v23 = vpop.eup %805 }
 0x327   : > { %v486_v24 = vsel %vm485_vm13, %v806_v23, 0.0 }
 0x328   : > { %487 = vadd.xlane.f32.xlu1 %v486_v24 }
 0x329   : > { %920 = shalt.err (!%p917_p9)
}
 0x32a   : > { %729 = dma.vmem_to_hbm [thread:$0]  (%p1106_p13), %s595_s26, 128, %s597_s27, %s569_s28   ;;  %vm495_vm14 = vcmask 8192  }
 0x32b   : > { %s578_s16 = scalar_lea.hbm %s1266_s5, %s1070_s10  ;;  %s249_s18 = scalar_lea.vmem [#allocation10], %s1137_s23 }
 0x32c   : > { %s580_s19 = sshll.u32 %s249_s18, 4  ;;  %s582_s25 = sshll.u32 %s578_s16, 4  ;;  %s581_s19 = int_to_ptr.vmem [resolvable:$true] %s580_s19  ;;  %s583_s25 = int_to_ptr.hbm [resolvable:$true] %s582_s25 }
 0x32d   : > { %s565_s26 = scalar_lea.sflag [#allocation7], %s1137_s23  ;;  %s935_s27 = sshra.s32 %s583_s25, 4  ;;  %s936_s27 = int_to_ptr.hbm [resolvable:$true] %s935_s27 }
 0x32e   : > { %s937_s28 = scalar_lea.hbm %s936_s27, 1  ;;  %s941_s9 = scalar_lea.hbm %s1266_s5, 2 }
 0x32f   : > { %p938_p10 = scmp.ne.s32.totalorder %s936_s27, %s937_s28  ;;  %p942_p2 = scmp.lt.s32.totalorder %s936_s27, %s1266_s5 }
 0x330   : > { %p943_p6 = scmp.lt.s32.totalorder %s941_s9, %s937_s28 }
 0x331   : > { %p939_p11 = pnand %p938_p10, %p1106_p13 }
 0x332   : > { %p944_p1 = por %p943_p6, %p942_p2 }
 0x333   : > { %p940_p0 = pneg %p939_p11 }
 0x335   : > { %p945_p3 = pnand %p944_p1, %p940_p0 }
 0x39b   : > { %v488_v41 = vpop.xlane.xlu1 %487 }
 0x39c   : > { %807 = vlog2.f32 %v488_v41 }
 0x3a2   : > { %v808_v25 = vpop.eup %807 }
 0x3a3   : > { %v490_v26 = vmul.f32 0.6931472, %v808_v25 }
 0x3a5   : > { %v491_v27 = vmul.f32 0.2, %v490_v26 }
 0x3a7   : > { %v493_v28 = vperm.slane %v491_v27, %v1198_v38 }
 0x3a9   : > { %496 = vst.msk [vmem:[%s249_s18] sm:$0x1] %vm495_vm14, %v493_v28 }
 0x3aa   : > { %948 = shalt.err (!%p945_p3)
}
 0x3ab   : > { %728 = dma.vmem_to_hbm [thread:$0]  (%p1106_p13), %s581_s19, 16, %s583_s25, %s565_s26  }
 0x3ac PF: > { %s608_s23 = sand.u32 1, %s985_s0   ;;  %p1276_p5 = scmp.ge.s32.totalorder %s997_s30, 2 }
 0x3ad   : > { %s609_s8 = scalar_lea.sflag [#allocation7], %s608_s23 }
 0x3ae   : > { %p741_p12 = pnand %p1276_p5, %p1111_p4 }
 0x3b0   : > { %p742_p8 = pneg %p741_p12 }
 0x3b2   : > { %976 = dma.done.wait (%p742_p8), %s609_s8, 16  }
 0x3b3   : > { %978 = vsyncadd (%p742_p8), %s609_s8, 4294967280  ;;  %s618_s12 = scalar_lea.sflag [#allocation12], %s608_s23 }
 0x3b4   : > { %980 = dma.done.wait (%p742_p8), %s618_s12, 128  }
 0x3b5   : > { %982 = vsyncadd (%p742_p8), %s618_s12, 4294967168  ;;  %p37_p13 = scmp.ge.s32.totalorder %s1086_s17, 4   ;;  %s1277_s0 = smov %s989_s29 }
 0x3b6   : > { %s1278_s29 = smov %s993_s1  ;;  %s1279_s1 = smov %s1098_s20 }
 0x3b7   : > { %s1280_s30 = smov %s1086_s17  ;;  %39 = sbr.rel (!%p37_p13) target bundleno = 15 (0xf), region = 99 }
 0x3bc   :  { %624 = vsyncpa [#allocation6], 1 }
 0x3bd   :  { %626 = vsyncpa [#allocation6 + $0x1], 1 }
 0x3be   :  { %627 = vsyncpa [#allocation9], 1 }
 0x3bf   :  { %628 = vsyncpa [#allocation7], 1 }
 0x3c0   :  { %630 = vsyncpa [#allocation7 + $0x1], 1 }
 0x3c1   :  { %631 = vsyncpa [#allocation12], 1 }
 0x3c2   :  { %633 = vsyncpa [#allocation12 + $0x1], 1 }

// kernel: tpu_custom_call.1
= control target key start
LH: loop header
LB: loop body
LE: loop exit
PB: predicated region body
PF: predicated region fallthrough
CT: control target
= control target key end

     0   :  { %s999_s27 = smov [#allocation3]   ;;  %s1000_s28 = smov [#allocation4]   ;;  %s1262_s0 = inlined_call_operand.hbm [shape: s32[2], index: 0, kind: input, shape index: {}]   ;;  %s1263_s2 = inlined_call_operand.hbm [shape: f32[2,8,128], index: 2, kind: input, shape index: {}]   ;;  %s1264_s3 = inlined_call_operand.hbm [shape: f32[2,128,128], index: 3, kind: input, shape index: {}]   ;;  %s1265_s4 = inlined_call_operand.vmem [shape: f32[2,128], index: 4, kind: input, shape index: {}]   ;;  %s1266_s5 = inlined_call_operand.hbm [shape: f32[2,1,2], index: 5, kind: output, shape index: {0}]   ;;  %s1267_s6 = inlined_call_operand.hbm [shape: f32[2,8,128], index: 6, kind: output, shape index: {1}]   ;;  %s1268_s1 = inlined_call_operand.hbm [shape: s32[2], index: 1, kind: input, shape index: {}]  }
   0x1   :  { %s13_s23 = sshll.u32 %s1262_s0, 4  ;;  %s18_s26 = sshll.u32 %s1268_s1, 4  ;;  %s14_s23 = int_to_ptr.hbm [resolvable:$true] %s13_s23  ;;  %s19_s26 = int_to_ptr.hbm [resolvable:$true] %s18_s26 }
   0x2   :  { %16 = dma.hbm_to_smem %s14_s23, 16, %s999_s27, [#allocation2] }
   0x3   :  { %21 = dma.hbm_to_smem %s19_s26, 16, %s1000_s28, [#allocation2] }
   0x4   :  { %965 = dma.done.wait [#allocation2], 32 }
   0x5   :  { %966 = vsyncadd [#allocation2], 4294967264 }
   0x6   :  { %24 = sfence }
   0x7   :  { %25 = vsyncpa [#allocation6], 0 }
   0x8   :  { %27 = vsyncpa [#allocation6 + $0x1], 0 }
   0x9   :  { %28 = vsyncpa [#allocation9], 0 }
   0xa   :  { %29 = vsyncpa [#allocation7], 0 }
   0xb   :  { %31 = vsyncpa [#allocation7 + $0x1], 0 }
   0xc   :  { %32 = vsyncpa [#allocation12], 0 }
   0xd   :  { %34 = vsyncpa [#allocation12 + $0x1], 0  ;;  %s1046_s0 = smov 0   ;;  %s1048_s29 = smov 0  }
   0xe   :  { %s1050_s1 = smov 0   ;;  %s1052_s30 = smov 0  }
   0xf LB: > { %s176_s9 = sshll.u32 %s1264_s3, 4  ;;  %s1070_s10 = sadd.s32 4294967295, %s997_s30   ;;  %s997_s30 = sphi %s1052_s30, %s1280_s30   ;;  %s993_s1 = sphi %s1050_s1, %s1279_s1   ;;  %s989_s29 = sphi %s1048_s29, %s1278_s29   ;;  %s985_s0 = sphi %s1046_s0, %s1277_s0   ;;  %s177_s9 = int_to_ptr.hbm [resolvable:$true] %s176_s9 }
  0x10   : > { %p708_p0 = scmp.ge.s32.totalorder %s997_s30, 1  ;;  %p61_p1 = scmp.eq.s32.totalorder %s1070_s10, 0 }
  0x11   : > { %p165_p2 = scmp.lt.s32.totalorder %s997_s30, 3  ;;  %s1001_s12 = smov [#allocation8]  }
  0x12   : > { %s178_s13 = sshll.u32 %s1001_s12, 4  ;;  %s1002_s14 = smov 128   ;;  %s179_s13 = int_to_ptr.vmem [resolvable:$true] %s178_s13 }
  0x13   : > { %p1075_p3 = pnand %p708_p0, %p165_p2  ;;  %s1003_s15 = smov 8  }
  0x14   : > { %s707_s16 = sadd.s32 4294967294, %s997_s30   ;;  %s1086_s17 = sadd.s32 1, %s997_s30  }
  0x15   : > { %p732_p4 = pneg %p1075_p3  ;;  %s47_s18 = sadd.s32 1, %s993_s1 }
  0x16   : > { %s44_s19 = ssub.s32 %s997_s30, %s1086_s17  ;;  %p54_p7 = scmp.ne.s32.totalorder %s993_s1, %s989_s29 }
  0x17   : > { %p733_p6 = pnand %p732_p4, %p61_p1  ;;  %p45_p8 = scmp.eq.s32.totalorder %s44_s19, 0 }
  0x18   : > { %p55_p9 = scmp.eq.s32.totalorder %s997_s30, 0  ;;  %p60_p10 = scmp.ne.s32.totalorder %s989_s29, %s985_s0 }
  0x19   : > { %735 = dma.hbm_to_vmem [thread:$0]  (!%p733_p6), %s177_s9, 4096, %s179_s13, [#allocation9], %s1002_s14, %s1002_s14, %s1003_s15  }
  0x1a   : > { %p126_p11 = scmp.eq.s32.totalorder %s1070_s10, 1  ;;  %p1102_p12 = por %p61_p1, %p60_p10 }
  0x1b   : > { %s1098_s20 = scalar_select %p45_p8, %s993_s1, %s47_s18  }
  0x1c   : > { %p1106_p13 = por %p126_p11, %p54_p7  ;;  %p132_p0 = scmp.eq.s32.totalorder %s707_s16, 1 }
  0x1d   : > { %p56_p2 = por %p55_p9, %p54_p7  ;;  %s195_s23 = sand.u32 1, %s993_s1  }
  0x1e   : > { %p1111_p4 = por %p132_p0, %p60_p10  ;;  %p748_p6 = scmp.lt.s32.totalorder %s997_s30, 2 }
  0x1f   : > { %s711_s25 = sshll.u32 %s195_s23, 3  ;;  %s712_s26 = sshll.u32 %s997_s30, 3 }
  0x20   : > { %s203_s7 = scalar_lea.hbm %s1263_s2, %s712_s26  ;;  %s199_s9 = scalar_lea.vmem [#allocation5], %s711_s25 }
  0x21   : > { %s205_s8 = sshll.u32 %s203_s7, 4  ;;  %s207_s12 = sshll.u32 %s199_s9, 4  ;;  %s206_s8 = int_to_ptr.hbm [resolvable:$true] %s205_s8  ;;  %s208_s12 = int_to_ptr.vmem [resolvable:$true] %s207_s12 }
  0x22   : > { %p1120_p8 = pnand %p748_p6, %p56_p2  ;;  %s196_s14 = scalar_lea.sflag [#allocation6], %s195_s23 }
  0x23   : > { %s863_s15 = sshra.s32 %s206_s8, 4  ;;  %s870_s25 = scalar_lea.hbm %s1263_s2, 16  ;;  %s864_s15 = int_to_ptr.hbm [resolvable:$true] %s863_s15 }
  0x24   : > { %s865_s16 = scalar_lea.hbm %s864_s15, 8  ;;  %p867_p9 = pneg %p1120_p8 }
  0x25   : > { %p866_p7 = scmp.ne.s32.totalorder %s864_s15, %s865_s16  ;;  %p871_p0 = scmp.lt.s32.totalorder %s864_s15, %s1263_s2 }
  0x26   : > { %p872_p2 = scmp.lt.s32.totalorder %s870_s25, %s865_s16 }
  0x27   : > { %p868_p10 = pnand %p867_p9, %p866_p7 }
  0x28   : > { %p873_p6 = por %p872_p2, %p871_p0 }
  0x29   : > { %p869_p11 = pneg %p868_p10 }
  0x2b   : > { %p874_p5 = pnand %p873_p6, %p869_p11 }
  0x2d   : > { %877 = shalt.err (!%p874_p5)
}
  0x2e   : > { %739 = dma.hbm_to_vmem [thread:$0]  (!%p1120_p8), %s206_s8, 128, %s208_s12, %s196_s14  }
  0x2f   : > { %216 = sbr.rel (%p1075_p3) target bundleno = 940 (0x3ac), region = 32  ;;  %s1137_s23 = sand.u32 (!%p1075_p3), 1, %s989_s29  }
  0x30   : > { %s714_s28 = sshll.u32 (!%p1075_p3), %s1137_s23, 3  ;;  %s219_s7 = scalar_lea.sflag (!%p1075_p3), [#allocation6], %s1137_s23 }
  0x31   : > { %s1143_s9 = scalar_lea.vmem (!%p1075_p3), [#allocation5], %s714_s28 }
  0x34   : > { %968 = dma.done.wait (%p1102_p12), %s219_s7, 128  }
  0x35   : > { %970 = vsyncadd (%p1102_p12), %s219_s7, 4294967168 }
  0x36   : > { %972 = dma.done.wait (%p61_p1), [#allocation9], 4096  }
  0x37   : > { %974 = vsyncadd (%p61_p1), [#allocation9], 4294963200  ;;  %v273_v0 = vld [vmem:[#allocation8 + $0x78] sm:$0xff]  ;;  %v272_v2 = vld [vmem:[#allocation8 + $0x70] sm:$0xff]  ;;  %v1004_v34 = vmov 0   ;;  %s1162_s8 = sld [smem:[#allocation3 + %s1070_s10]]  ;;  %v331_v37 = vlaneseq }
  0x38   : > { %291 = vmatpush.xpose.msra.mxu0 %v273_v0  ;;  %v289_v1 = vld [vmem:[#allocation8 + $0xf8] sm:$0xff]  ;;  %393 = vmatpush.msra.mxu3 %v273_v0  ;;  %v288_v3 = vld [vmem:[#allocation8 + $0xf0] sm:$0xff]  ;;  %v271_v4 = vld [vmem:[#allocation8 + $0x68] sm:$0xff]  ;;  %s717_s12 = sshll.u32 %s1070_s10, 7  ;;  %s535_s14 = sld [smem:[#allocation4 + %s1070_s10]] }
  0x39   : > { %311 = vmatpush.xpose.msra.mxu1 %v289_v1  ;;  %v270_v5 = vld [vmem:[#allocation8 + $0x60] sm:$0xff]  ;;  %v287_v6 = vld [vmem:[#allocation8 + $0xe8] sm:$0xff]  ;;  %v269_v7 = vld [vmem:[#allocation8 + $0x58] sm:$0xff]  ;;  %v332_v39 = vshrl.u32 %v331_v37, 7  ;;  %s1177_s13 = scalar_lea.vmem [#allocation8], %s717_s12  ;;  %s256_s15 = scalar_lea.vmem [#allocation11], %s714_s28 }
  0x3a   : > { %394 = vmatpush.msra.mxu3 %v272_v2  ;;  %v268_v8 = vld [vmem:[#allocation8 + $0x50] sm:$0xff]  ;;  %v286_v9 = vld [vmem:[#allocation8 + $0xe0] sm:$0xff]  ;;  %v267_v10 = vld [vmem:[#allocation8 + $0x48] sm:$0xff]  ;;  %s719_s16 = sshll.u32 %s1070_s10, 3  ;;  %s594_s26 = sshll.u32 %s256_s15, 4  ;;  %s595_s26 = int_to_ptr.vmem [resolvable:$true] %s594_s26 }
  0x3b   : > { %v266_v11 = vld [vmem:[#allocation8 + $0x40] sm:$0xff]  ;;  %v285_v12 = vld [vmem:[#allocation8 + $0xd8] sm:$0xff]  ;;  %v264_v14 = vld [vmem:[#allocation8 + $0x30] sm:$0xff]  ;;  %s592_s25 = scalar_lea.hbm %s1267_s6, %s719_s16  ;;  %s569_s28 = scalar_lea.sflag [#allocation12], %s1137_s23 }
  0x3c   : > { %292 = vmatpush.xpose.msra.mxu0 %v272_v2  ;;  %395 = vmatpush.msra.mxu3 %v271_v4  ;;  %v265_v13 = vld [vmem:[#allocation8 + $0x38] sm:$0xff]  ;;  %v284_v15 = vld [vmem:[#allocation8 + $0xd0] sm:$0xff]  ;;  %v263_v16 = vld [vmem:[#allocation8 + $0x28] sm:$0xff]  ;;  %s596_s27 = sshll.u32 %s592_s25, 4  ;;  %s597_s27 = int_to_ptr.hbm [resolvable:$true] %s596_s27 }
  0x3d   : > { %312 = vmatpush.xpose.msra.mxu1 %v288_v3  ;;  %v262_v17 = vld [vmem:[#allocation8 + $0x20] sm:$0xff]  ;;  %v283_v18 = vld [vmem:[#allocation8 + $0xc8] sm:$0xff]  ;;  %v261_v19 = vld [vmem:[#allocation8 + $0x18] sm:$0xff]  ;;  %v333_v41 = vstv %s1162_s8  ;;  %s907_s7 = sshra.s32 %s597_s27, 4  ;;  %s913_s8 = scalar_lea.hbm %s1267_s6, 16  ;;  %s908_s7 = int_to_ptr.hbm [resolvable:$true] %s907_s7 }
  0x3e   : > { %396 = vmatpush.msra.mxu3 %v270_v5  ;;  %v260_v20 = vld [vmem:[#allocation8 + $0x10] sm:$0xff]  ;;  %v282_v21 = vld [vmem:[#allocation8 + $0xc0] sm:$0xff]  ;;  %v259_v22 = vld [vmem:[#allocation8 + $0x8] sm:$0xff]  ;;  %vm1168_vm2 = vcmp.ge.s32.totalorder %v332_v39, %v333_v41  ;;  %v536_v39 = vstv %s535_s14  ;;  %p914_p12 = scmp.lt.s32.totalorder %s908_s7, %s1267_s6 }
  0x3f   : > { %v258_v23 = vld [vmem:[#allocation8] sm:$0xff]  ;;  %v281_v24 = vld [vmem:[#allocation8 + $0xb8] sm:$0xff]  ;;  %v280_v25 = vld [vmem:[#allocation8 + $0xb0] sm:$0xff] }
  0x40   : > { %293 = vmatpush.xpose.msra.mxu0 %v271_v4  ;;  %397 = vmatpush.msra.mxu3 %v269_v7  ;;  %v279_v26 = vld [vmem:[#allocation8 + $0xa8] sm:$0xff]  ;;  %v278_v27 = vld [vmem:[#allocation8 + $0xa0] sm:$0xff]  ;;  %v277_v28 = vld [vmem:[#allocation8 + $0x98] sm:$0xff] }
  0x41   : > { %313 = vmatpush.xpose.msra.mxu1 %v287_v6  ;;  %v276_v29 = vld [vmem:[#allocation8 + $0x90] sm:$0xff]  ;;  %v275_v30 = vld [vmem:[#allocation8 + $0x88] sm:$0xff]  ;;  %v274_v31 = vld [vmem:[#allocation8 + $0x80] sm:$0xff] }
  0x42   : > { %398 = vmatpush.msra.mxu3 %v268_v8  ;;  %v1154_v32 = vld [vmem:[%s1143_s9] sm:$0xff]  ;;  %v335_v33 = vld [vmem:[%s1265_s4] sm:$0x3]  ;;  %v514_v54 = vld [vmem:[%s1177_s13 + $0x78] sm:$0xff]  ;;  %s909_s9 = scalar_lea.hbm %s908_s7, 8 }
  0x43   : > { %vm336_vm0 = vcmp.lt.f32.partialorder %v335_v33, 0.5  ;;  %515 = vmatpush.xpose.msra.mxu2 %v514_v54  ;;  %v513_v56 = vld [vmem:[%s1177_s13 + $0x70] sm:$0xff]  ;;  %v512_v58 = vld [vmem:[%s1177_s13 + $0x68] sm:$0xff]  ;;  %v511_v60 = vld [vmem:[%s1177_s13 + $0x60] sm:$0xff]  ;;  %p910_p1 = scmp.ne.s32.totalorder %s908_s7, %s909_s9  ;;  %p915_p8 = scmp.lt.s32.totalorder %s913_s8, %s909_s9 }
  0x44   : > { %294 = vmatpush.xpose.msra.mxu0 %v270_v5  ;;  %399 = vmatpush.msra.mxu3 %v267_v10  ;;  %v337_v35 = vsel %vm336_vm0, 1, %v1004_v34 }
  0x45   : > { %314 = vmatpush.xpose.msra.mxu1 %v286_v9  ;;  %v338_v36 = vrot.slane %v337_v35, 1  ;;  %v343_v40 = vperm.slane %v337_v35, 0  ;;  %p911_p3 = pnand %p910_p1, %p1106_p13  ;;  %p916_p7 = por %p915_p8, %p914_p12 }
  0x46   : > { %400 = vmatpush.msra.mxu3 %v266_v11 }
  0x47   : > { %vm339_vm1 = vcmp.ne.s32.totalorder %v338_v36, 0  ;;  %vm345_vm3 = vcmp.eq.s32.totalorder %v343_v40, 1  ;;  %516 = vmatpush.xpose.msra.mxu2 %v513_v56  ;;  %p912_p5 = pneg %p911_p3 }
  0x48   : > { %295 = vmatpush.xpose.msra.mxu0 %v269_v7  ;;  %401 = vmatpush.msra.mxu3 %v265_v13  ;;  %v342_v38 = vsel %vm339_vm1, 1, %v1004_v34  ;;  %vm347_vm5 = vmor %vm1168_vm2, %vm345_vm3 }
  0x49   : > { %315 = vmatpush.xpose.msra.mxu1 %v285_v12  ;;  %v344_v42 = vperm.slane %v342_v38, 0  ;;  %v1198_v38 = vand.u32 127, %v331_v37  ;;  %p917_p9 = pnand %p916_p7, %p912_p5 }
  0x4a   : > { %402 = vmatpush.msra.mxu3 %v264_v14 }
  0x4b   : > { %vm346_vm4 = vcmp.eq.s32.totalorder %v344_v42, 1  ;;  %517 = vmatpush.xpose.msra.mxu2 %v512_v58  ;;  %vm537_vm15 = vcmp.ge.s32.totalorder %v1198_v38, %v536_v39 }
  0x4c   : > { %296 = vmatpush.xpose.msra.mxu0 %v268_v8  ;;  %403 = vmatpush.msra.mxu3 %v263_v16  ;;  %vm348_vm6 = vmor %vm1168_vm2, %vm346_vm4 }
  0x4d   : > { %316 = vmatpush.xpose.msra.mxu1 %v284_v15  ;;  %vm540_vm0 = vmor %vm1168_vm2, %vm537_vm15 }
  0x4e   : > { %404 = vmatpush.msra.mxu3 %v262_v17 }
  0x4f   : > { %518 = vmatpush.xpose.msra.mxu2 %v511_v60 }
  0x50   : > { %297 = vmatpush.xpose.msra.mxu0 %v267_v10  ;;  %405 = vmatpush.msra.mxu3 %v261_v19 }
  0x51   : > { %317 = vmatpush.xpose.msra.mxu1 %v283_v18 }
  0x52   : > { %406 = vmatpush.msra.mxu3 %v260_v20 }
  0x54   : > { %298 = vmatpush.xpose.msra.mxu0 %v266_v11  ;;  %407 = vmatpush.msra.mxu3 %v259_v22 }
  0x55   : > { %318 = vmatpush.xpose.msra.mxu1 %v282_v21 }
  0x56   : > { %408 = vmatpush.msra.mxu3 %v258_v23 }
  0x58   : > { %413 = vmatpush.msrb.mxu3 %v289_v1  ;;  %299 = vmatpush.xpose.msra.mxu0 %v265_v13  ;;  %v510_v1 = vld [vmem:[%s1177_s13 + $0x58] sm:$0xff] }
  0x59   : > { %319 = vmatpush.xpose.msra.mxu1 %v281_v24  ;;  %519 = vmatpush.xpose.msra.mxu2 %v510_v1 }
  0x5a   : > { %414 = vmatpush.msrb.mxu3 %v288_v3 }
  0x5c   : > { %415 = vmatpush.msrb.mxu3 %v287_v6  ;;  %300 = vmatpush.xpose.msra.mxu0 %v264_v14  ;;  %v509_v6 = vld [vmem:[%s1177_s13 + $0x50] sm:$0xff]  ;;  %v508_v14 = vld [vmem:[%s1177_s13 + $0x48] sm:$0xff] }
  0x5d   : > { %320 = vmatpush.xpose.msra.mxu1 %v280_v25  ;;  %520 = vmatpush.xpose.msra.mxu2 %v509_v6 }
  0x5e   : > { %416 = vmatpush.msrb.mxu3 %v286_v9 }
  0x60   : > { %417 = vmatpush.msrb.mxu3 %v285_v12  ;;  %301 = vmatpush.xpose.msra.mxu0 %v263_v16 }
  0x61   : > { %321 = vmatpush.xpose.msra.mxu1 %v279_v26  ;;  %521 = vmatpush.xpose.msra.mxu2 %v508_v14 }
  0x62   : > { %418 = vmatpush.msrb.mxu3 %v284_v15 }
  0x64   : > { %419 = vmatpush.msrb.mxu3 %v283_v18  ;;  %302 = vmatpush.xpose.msra.mxu0 %v262_v17 }
  0x65   : > { %322 = vmatpush.xpose.msra.mxu1 %v278_v27 }
  0x66   : > { %420 = vmatpush.msrb.mxu3 %v282_v21 }
  0x68   : > { %421 = vmatpush.msrb.mxu3 %v281_v24  ;;  %303 = vmatpush.xpose.msra.mxu0 %v261_v19  ;;  %v507_v19 = vld [vmem:[%s1177_s13 + $0x40] sm:$0xff]  ;;  %v506_v24 = vld [vmem:[%s1177_s13 + $0x38] sm:$0xff] }
  0x69   : > { %323 = vmatpush.xpose.msra.mxu1 %v277_v28  ;;  %522 = vmatpush.xpose.msra.mxu2 %v507_v19 }
  0x6a   : > { %422 = vmatpush.msrb.mxu3 %v280_v25  ;;  %v505_v25 = vld [vmem:[%s1177_s13 + $0x30] sm:$0xff] }
  0x6c   : > { %423 = vmatpush.msrb.mxu3 %v279_v26  ;;  %304 = vmatpush.xpose.msra.mxu0 %v260_v20  ;;  %v504_v26 = vld [vmem:[%s1177_s13 + $0x28] sm:$0xff] }
  0x6d   : > { %324 = vmatpush.xpose.msra.mxu1 %v276_v29  ;;  %523 = vmatpush.xpose.msra.mxu2 %v506_v24 }
  0x6e   : > { %424 = vmatpush.msrb.mxu3 %v278_v27  ;;  %v503_v27 = vld [vmem:[%s1177_s13 + $0x20] sm:$0xff] }
  0x70   : > { %425 = vmatpush.msrb.mxu3 %v277_v28  ;;  %305 = vmatpush.xpose.msra.mxu0 %v259_v22  ;;  %v502_v28 = vld [vmem:[%s1177_s13 + $0x18] sm:$0xff] }
  0x71   : > { %325 = vmatpush.xpose.msra.mxu1 %v275_v30  ;;  %524 = vmatpush.xpose.msra.mxu2 %v505_v25 }
  0x72   : > { %426 = vmatpush.msrb.mxu3 %v276_v29  ;;  %v501_v29 = vld [vmem:[%s1177_s13 + $0x10] sm:$0xff] }
  0x74   : > { %427 = vmatpush.msrb.mxu3 %v275_v30  ;;  %306 = vmatpush.xpose.msra.mxu0 %v258_v23  ;;  %v500_v30 = vld [vmem:[%s1177_s13 + $0x8] sm:$0xff] }
  0x75   : > { %326 = vmatpush.xpose.msra.mxu1 %v274_v31  ;;  %525 = vmatpush.xpose.msra.mxu2 %v504_v26 }
  0x76   : > { %428 = vmatpush.msrb.mxu3 %v274_v31  ;;  %v499_v31 = vld [vmem:[%s1177_s13] sm:$0xff] }
  0x77   : > { %307 = vmatmul.f32.vlgmr.msra.gmra.mxu0 %v1154_v32 }
  0x78   : > { %327 = vmatmul.f32.vlgmr.msra.gmra.mxu1 %v1154_v32 }
  0x79   : > { %526 = vmatpush.xpose.msra.mxu2 %v503_v27 }
  0x7d   : > { %527 = vmatpush.xpose.msra.mxu2 %v502_v28 }
  0x81   : > { %528 = vmatpush.xpose.msra.mxu2 %v501_v29 }
  0x85   : > { %529 = vmatpush.xpose.msra.mxu2 %v500_v30 }
  0x89   : > { %530 = vmatpush.xpose.msra.mxu2 %v499_v31 }
  0x8c   : > { %531 = vmatmul.f32.vlgmr.msra.gmra.mxu2 %v1154_v32 }
  0xf4   : > { %v308_v44 = vpop.f32.mrf.mxu0 }
  0xf5   : > { %v349_v45 = vsel %vm347_vm5, -inf, %v308_v44  ;;  %v328_v46 = vpop.f32.mrf.mxu1 }
  0xf6   : > { %v351_v47 = vmul.f32 4.0, %v349_v45  ;;  %v350_v48 = vsel %vm348_vm6, -inf, %v328_v46 }
  0xf7   : > { %v352_v50 = vmul.f32 4.0, %v350_v48 }
  0xf8   : > { %v353_v49 = vmul.f32 1.442695, %v351_v47 }
  0xf9   : > { %v355_v51 = vmul.f32 1.442695, %v352_v50 }
  0xfa   : > { %789 = vpow2.f32 %v353_v49 }
  0xfb   : > { %791 = vpow2.f32 %v355_v51 }
 0x100   : > { %v790_v52 = vpop.eup %789 }
 0x101   : > { %357 = vadd.xlane.f32.xlu0 %v790_v52  ;;  %v792_v53 = vpop.eup %791 }
 0x109   : > { %359 = vadd.xlane.f32.xlu0 %v792_v53 }
 0x10f   : > { %v532_v40 = vpop.f32.mrf.mxu2 }
 0x110   : > { %v541_v42 = vsel %vm540_vm0, -inf, %v532_v40 }
 0x111   : > { %v542_v44 = vmul.f32 4.0, %v541_v42 }
 0x113   : > { %v543_v45 = vmul.f32 1.442695, %v542_v44 }
 0x174   : > { %v358_v55 = vpop.xlane.xlu0 %357 }
 0x175   : > { %v361_v57 = vadd.f32 1e-06, %v358_v55 }
 0x177   : > { %793 = vrcp.f32 %v361_v57  ;;  %v374_v2 = vand.u32 2147483648, %v361_v57  ;;  %v372_v4 = vand.u32 2147483647, %v361_v57  ;;  %vm368_vm8 = vweird.f32 %v361_v57 }
 0x179   : > { %v375_v8 = vor.u32 1.1754944e-38, %v374_v2  ;;  %vm373_vm10 = vcmp.eq.f32.partialorder %v372_v4, 8.507059e+37 }
 0x17c   : > { %v360_v59 = vpop.xlane.xlu0 %359 }
 0x17d   : > { %v794_v61 = vpop.eup %793  ;;  %v362_v62 = vadd.f32 1e-06, %v360_v59 }
 0x17e   : > { %v364_v63 = vmul.f32 %v794_v61, %v361_v57  ;;  %vm369_vm7 = vweird.f32 %v794_v61 }
 0x17f   : > { %795 = vrcp.f32 %v362_v62  ;;  %vm370_vm9 = vmor %vm368_vm8, %vm369_vm7  ;;  %v389_v15 = vand.u32 2147483648, %v362_v62  ;;  %v387_v17 = vand.u32 2147483647, %v362_v62  ;;  %vm383_vm12 = vweird.f32 %v362_v62 }
 0x180   : > { %v365_v0 = vsub.f32 1.0, %v364_v63  ;;  %797 = vpow2.f32 %v543_v45 }
 0x181   : > { %v390_v20 = vor.u32 1.1754944e-38, %v389_v15  ;;  %vm388_vm14 = vcmp.eq.f32.partialorder %v387_v17, 8.507059e+37 }
 0x182   : > { %v366_v3 = vmul.f32 %v794_v61, %v365_v0 }
 0x184   : > { %v367_v5 = vadd.f32 %v794_v61, %v366_v3 }
 0x185   : > { %v796_v7 = vpop.eup %795 }
 0x186   : > { %v379_v9 = vmul.f32 %v796_v7, %v362_v62  ;;  %v371_v10 = vsel %vm370_vm9, %v794_v61, %v367_v5  ;;  %vm384_vm11 = vweird.f32 %v796_v7  ;;  %v798_v46 = vpop.eup %797 }
 0x187   : > { %v376_v11 = vsel %vm373_vm10, %v375_v8, %v371_v10  ;;  %vm385_vm13 = vmor %vm383_vm12, %vm384_vm11  ;;  %545 = vadd.xlane.f32.xlu0 %v798_v46  ;;  %vm478_vm11 = vcmask 1041409   ;;  %vm471_vm12 = vcmp.ge.s32.totalorder %v1198_v38, %v333_v41 }
 0x188   : > { %v380_v12 = vsub.f32 1.0, %v379_v9  ;;  %v377_v13 = vmul.f32 %v790_v52, %v376_v11 }
 0x18a   : > { %409 = vmatmul.f32.vlgmr.msra.gmra.mxu3 %v377_v13  ;;  %v381_v16 = vmul.f32 %v796_v7, %v380_v12 }
 0x18c   : > { %v382_v18 = vadd.f32 %v796_v7, %v381_v16 }
 0x18e   : > { %v386_v21 = vsel %vm385_vm13, %v796_v7, %v382_v18  ;;  %vm485_vm13 = vcmask 58368  }
 0x18f   : > { %v391_v22 = vsel %vm388_vm14, %v390_v20, %v386_v21 }
 0x190   : > { %v392_v23 = vmul.f32 %v792_v53, %v391_v22 }
 0x192   : > { %429 = vmatmul.f32.vlgmr.msrb.gmra.mxu3 %v392_v23 }
 0x1fa   : > { %v546_v3 = vpop.xlane.xlu0 %545 }
 0x1fb   : > { %v547_v4 = vadd.f32 1e-06, %v546_v3 }
 0x1fd   : > { %v559_v7 = vand.u32 2147483648, %v547_v4  ;;  %vm553_vm7 = vweird.f32 %v547_v4  ;;  %v557_v9 = vand.u32 2147483647, %v547_v4 }
 0x1ff   : > { %v560_v11 = vor.u32 1.1754944e-38, %v559_v7  ;;  %vm558_vm10 = vcmp.eq.f32.partialorder %v557_v9, 8.507059e+37 }
 0x20d   : > { %v410_v33 = vpop.f32.mrf.mxu3 }
 0x20e   : > { %v433_v34 = vmul.f32 %v410_v33, %v410_v33 }
 0x210   : > { %435 = vadd.xlane.f32.xlu1 %v433_v34 }
 0x215   : > { %v430_v35 = vpop.f32.mrf.mxu3 }
 0x216   : > { %v434_v36 = vmul.f32 %v430_v35, %v430_v35 }
 0x218   : > { %437 = vadd.xlane.f32.xlu1 %v434_v36 }
 0x283   : > { %v436_v47 = vpop.xlane.xlu1 %435 }
 0x284   : > { %v439_v48 = vmax.f32 %v436_v47, 1e-12 }
 0x286   : > { %799 = vrsqrt.f32 %v439_v48  ;;  %vm447_vm2 = vweird.f32 %v439_v48 }
 0x28b   : > { %v438_v49 = vpop.xlane.xlu1 %437 }
 0x28c   : > { %v800_v50 = vpop.eup %799  ;;  %v440_v37 = vmax.f32 %v438_v49, 1e-12 }
 0x28d   : > { %v442_v51 = vmul.f32 %v800_v50, %v439_v48  ;;  %vm448_vm1 = vweird.f32 %v800_v50 }
 0x28e   : > { %801 = vrsqrt.f32 %v440_v37  ;;  %vm449_vm3 = vmor %vm447_vm2, %vm448_vm1  ;;  %vm457_vm5 = vweird.f32 %v440_v37 }
 0x28f   : > { %v443_v52 = vmul.f32 %v800_v50, %v442_v51  ;;  %803 = vrcp.f32 %v547_v4 }
 0x291   : > { %v444_v53 = vmul.f32 0.5, %v443_v52 }
 0x293   : > { %v445_v54 = vsub.f32 1.5, %v444_v53 }
 0x294   : > { %v802_v43 = vpop.eup %801 }
 0x295   : > { %v452_v55 = vmul.f32 %v802_v43, %v440_v37  ;;  %v446_v56 = vmul.f32 %v800_v50, %v445_v54  ;;  %vm458_vm4 = vweird.f32 %v802_v43  ;;  %v804_v5 = vpop.eup %803 }
 0x296   : > { %vm459_vm6 = vmor %vm457_vm5, %vm458_vm4  ;;  %v549_v6 = vmul.f32 %v804_v5, %v547_v4  ;;  %vm554_vm8 = vweird.f32 %v804_v5 }
 0x297   : > { %v453_v57 = vmul.f32 %v802_v43, %v452_v55  ;;  %v450_v58 = vsel %vm449_vm3, %v800_v50, %v446_v56  ;;  %vm555_vm9 = vmor %vm553_vm7, %vm554_vm8 }
 0x298   : > { %v461_v59 = vmul.f32 %v450_v58, %v410_v33  ;;  %v550_v8 = vsub.f32 1.0, %v549_v6 }
 0x299   : > { %v454_v60 = vmul.f32 0.5, %v453_v57 }
 0x29a   : > { %v463_v61 = vmul.f32 %v461_v59, %v1154_v32  ;;  %v551_v10 = vmul.f32 %v804_v5, %v550_v8 }
 0x29b   : > { %v455_v62 = vsub.f32 1.5, %v454_v60 }
 0x29c   : > { %465 = vadd.xlane.f32.xlu2 %v463_v61  ;;  %v552_v12 = vadd.f32 %v804_v5, %v551_v10 }
 0x29d   : > { %v456_v63 = vmul.f32 %v802_v43, %v455_v62 }
 0x29e   : > { %v556_v13 = vsel %vm555_vm9, %v804_v5, %v552_v12 }
 0x29f   : > { %v460_v0 = vsel %vm459_vm6, %v802_v43, %v456_v63 }
 0x2a0   : > { %v462_v1 = vmul.f32 %v460_v0, %v430_v35 }
 0x2a2   : > { %v464_v2 = vmul.f32 %v462_v1, %v1154_v32  ;;  %v561_v32 = vsel %vm558_vm10, %v560_v11, %v556_v13 }
 0x2a3   : > { %v562_v14 = vmul.f32 %v798_v46, %v561_v32 }
 0x2a4   : > { %467 = vadd.xlane.f32.xlu2 %v464_v2 }
 0x2a5   : > { %563 = vst [vmem:[%s256_s15] sm:$0xff] %v562_v14 }
 0x30f   : > { %v466_v15 = vpop.xlane.xlu2 %465 }
 0x310   : > { %v476_v17 = vperm.slane %v466_v15, %v1198_v38 }
 0x317   : > { %v468_v16 = vpop.xlane.xlu2 %467 }
 0x318   : > { %v477_v18 = vperm.slane %v468_v16, %v1198_v38 }
 0x31a   : > { %v479_v19 = vsel %vm478_vm11, %v477_v18, %v476_v17 }
 0x31b   : > { %v481_v20 = vsel %vm471_vm12, -inf, %v479_v19 }
 0x31c   : > { %v482_v21 = vmul.f32 5.0, %v481_v20 }
 0x31e   : > { %v483_v22 = vmul.f32 1.442695, %v482_v21 }
 0x320   : > { %805 = vpow2.f32 %v483_v22 }
 0x326   : > { %v806_v23 = vpop.eup %805 }
 0x327   : > { %v486_v24 = vsel %vm485_vm13, %v806_v23, 0.0 }
 0x328   : > { %487 = vadd.xlane.f32.xlu1 %v486_v24 }
 0x329   : > { %920 = shalt.err (!%p917_p9)
}
 0x32a   : > { %729 = dma.vmem_to_hbm [thread:$0]  (%p1106_p13), %s595_s26, 128, %s597_s27, %s569_s28   ;;  %vm495_vm14 = vcmask 8192  }
 0x32b   : > { %s578_s16 = scalar_lea.hbm %s1266_s5, %s1070_s10  ;;  %s249_s18 = scalar_lea.vmem [#allocation10], %s1137_s23 }
 0x32c   : > { %s580_s19 = sshll.u32 %s249_s18, 4  ;;  %s582_s25 = sshll.u32 %s578_s16, 4  ;;  %s581_s19 = int_to_ptr.vmem [resolvable:$true] %s580_s19  ;;  %s583_s25 = int_to_ptr.hbm [resolvable:$true] %s582_s25 }
 0x32d   : > { %s565_s26 = scalar_lea.sflag [#allocation7], %s1137_s23  ;;  %s935_s27 = sshra.s32 %s583_s25, 4  ;;  %s936_s27 = int_to_ptr.hbm [resolvable:$true] %s935_s27 }
 0x32e   : > { %s937_s28 = scalar_lea.hbm %s936_s27, 1  ;;  %s941_s9 = scalar_lea.hbm %s1266_s5, 2 }
 0x32f   : > { %p938_p10 = scmp.ne.s32.totalorder %s936_s27, %s937_s28  ;;  %p942_p2 = scmp.lt.s32.totalorder %s936_s27, %s1266_s5 }
 0x330   : > { %p943_p6 = scmp.lt.s32.totalorder %s941_s9, %s937_s28 }
 0x331   : > { %p939_p11 = pnand %p938_p10, %p1106_p13 }
 0x332   : > { %p944_p1 = por %p943_p6, %p942_p2 }
 0x333   : > { %p940_p0 = pneg %p939_p11 }
 0x335   : > { %p945_p3 = pnand %p944_p1, %p940_p0 }
 0x39b   : > { %v488_v41 = vpop.xlane.xlu1 %487 }
 0x39c   : > { %807 = vlog2.f32 %v488_v41 }
 0x3a2   : > { %v808_v25 = vpop.eup %807 }
 0x3a3   : > { %v490_v26 = vmul.f32 0.6931472, %v808_v25 }
 0x3a5   : > { %v491_v27 = vmul.f32 0.2, %v490_v26 }
 0x3a7   : > { %v493_v28 = vperm.slane %v491_v27, %v1198_v38 }
 0x3a9   : > { %496 = vst.msk [vmem:[%s249_s18] sm:$0x1] %vm495_vm14, %v493_v28 }
 0x3aa   : > { %948 = shalt.err (!%p945_p3)
}
 0x3ab   : > { %728 = dma.vmem_to_hbm [thread:$0]  (%p1106_p13), %s581_s19, 16, %s583_s25, %s565_s26  }
 0x3ac PF: > { %s608_s23 = sand.u32 1, %s985_s0   ;;  %p1276_p5 = scmp.ge.s32.totalorder %s997_s30, 2 }
 0x3ad   : > { %s609_s8 = scalar_lea.sflag [#allocation7], %s608_s23 }
 0x3ae   : > { %p741_p12 = pnand %p1276_p5, %p1111_p4 }
 0x3b0   : > { %p742_p8 = pneg %p741_p12 }
 0x3b2   : > { %976 = dma.done.wait (%p742_p8), %s609_s8, 16  }
 0x3b3   : > { %978 = vsyncadd (%p742_p8), %s609_s8, 4294967280  ;;  %s618_s12 = scalar_lea.sflag [#allocation12], %s608_s23 }
 0x3b4   : > { %980 = dma.done.wait (%p742_p8), %s618_s12, 128  }
 0x3b5   : > { %982 = vsyncadd (%p742_p8), %s618_s12, 4294967168  ;;  %p37_p13 = scmp.ge.s32.totalorder %s1086_s17, 4   ;;  %s1277_s0 = smov %s989_s29 }
 0x3b6   : > { %s1278_s29 = smov %s993_s1  ;;  %s1279_s1 = smov %s1098_s20 }
 0x3b7   : > { %s1280_s30 = smov %s1086_s17  ;;  %39 = sbr.rel (!%p37_p13) target bundleno = 15 (0xf), region = 99 }
 0x3bc   :  { %624 = vsyncpa [#allocation6], 1 }
 0x3bd   :  { %626 = vsyncpa [#allocation6 + $0x1], 1 }
 0x3be   :  { %627 = vsyncpa [#allocation9], 1 }
 0x3bf   :  { %628 = vsyncpa [#allocation7], 1 }
 0x3c0   :  { %630 = vsyncpa [#allocation7 + $0x1], 1 }
 0x3c1   :  { %631 = vsyncpa [#allocation12], 1 }
 0x3c2   :  { %633 = vsyncpa [#allocation12 + $0x1], 1 }

</bundles_post_ra>
